<compile_context>
chip_gen: v5e
topology: v5e:2x2
jax: 0.10.0
libtpu: 0.0.40
codegen_flags: <defaults>
</compile_context>

<pallas_src>
import numpy as np

import jax
import jax.numpy as jnp
from jax.experimental import pallas as pl
from jax.experimental.pallas import tpu as pltpu

BN_EPS = 1e-5
LANES = 128


# ----------------------- host-side operator packing (NumPy) -----------------------

class _Packer:
    """Packs many small 2D operator matrices into one (rows, 128) buffer.

    Each entry is zero-padded to 128 lanes and its row count rounded up to a
    multiple of 8 so every in-kernel static slice starts on a sublane tile.
    """

    def __init__(self, lanes=LANES):
        self.lanes = lanes
        self.chunks = []
        self.index = {}
        self.rows = 0

    def add(self, name, arr):
        arr = np.asarray(arr, np.float32)
        if arr.ndim == 1:
            arr = arr[None, :]
        r, c = arr.shape
        assert c <= self.lanes, (name, arr.shape)
        rp = -(-r // 8) * 8
        buf = np.zeros((rp, self.lanes), np.float32)
        buf[:r, :c] = arr
        self.index[name] = (self.rows, r, c)
        self.chunks.append(buf)
        self.rows += rp

    def finalize(self):
        return np.concatenate(self.chunks, axis=0), self.index


def _conv3x3_op(w, b, wsp, in_blocks):
    """Pack a 3x3 'same' conv for the (rows=H, lanes=(w,c)) slab layout.

    w: (3, 3, Cin, Cout), b: (Cout,).  in_blocks lists the channel counts of the
    lane-concatenated input blocks.  Returns the ky-stacked banded operator
    (3*W*Cin, W*Cout) (rows ordered ky=0,1,2 to match concat([x_up, x, x_dn]))
    and the bias row (1, W*Cout).
    """
    cin, cout = w.shape[2], w.shape[3]
    assert cin == sum(in_blocks)
    m = np.zeros((3, wsp * cin, wsp * cout), np.float32)
    col0, ch0 = 0, 0
    for cb in in_blocks:
        for wi in range(wsp):
            for c in range(cb):
                r = col0 + wi * cb + c
                ci = ch0 + c
                for ky in range(3):
                    for kx in range(3):
                        wo = wi - (kx - 1)
                        if 0 <= wo < wsp:
                            m[ky, r, wo * cout:(wo + 1) * cout] = w[ky, kx, ci, :]
        col0 += wsp * cb
        ch0 += cb
    brow = np.tile(np.asarray(b, np.float32), wsp)[None, :]
    return m.reshape(3 * wsp * cin, wsp * cout), brow


def _conv1x1_op(w, b, wsp):
    """w: (Cin, Cout), b: (Cout,) -> block-diagonal (W*Cin, W*Cout) + bias row."""
    cin, cout = w.shape
    m = np.zeros((wsp * cin, wsp * cout), np.float32)
    for wi in range(wsp):
        m[wi * cin:(wi + 1) * cin, wi * cout:(wi + 1) * cout] = w
    brow = np.tile(np.asarray(b, np.float32), wsp)[None, :]
    return m, brow


def _row_shift_ops(nb, h_l):
    """(R,R) row-shift matrices: su -> row h reads x[h-1], sd -> x[h+1].

    Block-diagonal over nb samples of h_l rows each; zero rows at sample edges
    reproduce the conv's zero padding along H."""
    r = nb * h_l
    su = np.zeros((r, r), np.float32)
    sd = np.zeros((r, r), np.float32)
    for i in range(r):
        if i % h_l != 0:
            su[i, i - 1] = 1.0
        if i % h_l != h_l - 1:
            sd[i, i + 1] = 1.0
    return su, sd


def _row_pool_ops(nb, h_l):
    """Even/odd row selectors (R/2, R) for a 2x1 row max-pool, per-sample."""
    r_out = nb * (h_l // 2)
    a = np.zeros((r_out, nb * h_l), np.float32)
    b = np.zeros_like(a)
    for o in range(r_out):
        s, j = divmod(o, h_l // 2)
        a[o, s * h_l + 2 * j] = 1.0
        b[o, s * h_l + 2 * j + 1] = 1.0
    return a, b


def _pool_cols(wsp, c):
    """0/1 selectors picking even / odd w positions: (W*C, (W/2)*C) each."""
    a = np.zeros((wsp * c, (wsp // 2) * c), np.float32)
    bsel = np.zeros_like(a)
    for w2 in range(wsp // 2):
        for ch in range(c):
            a[(2 * w2) * c + ch, w2 * c + ch] = 1.0
            bsel[(2 * w2 + 1) * c + ch, w2 * c + ch] = 1.0
    return a, bsel


def _bilinear_1d(n):
    """2x bilinear upsample matrix (2n, n), align_corners=False, edge clamped."""
    u = np.zeros((2 * n, n), np.float32)
    for j in range(2 * n):
        src = (j + 0.5) / 2.0 - 0.5
        i0 = int(np.floor(src))
        frac = src - i0
        u[j, min(max(i0, 0), n - 1)] += 1.0 - frac
        u[j, min(max(i0 + 1, 0), n - 1)] += frac
    return u


def _row_upsample_op(nb, h_l):
    """Block-diagonal (2R, R) bilinear row-upsample operator (per-sample clamp)."""
    u = _bilinear_1d(h_l)
    m = np.zeros((nb * 2 * h_l, nb * h_l), np.float32)
    for s in range(nb):
        m[s * 2 * h_l:(s + 1) * 2 * h_l, s * h_l:(s + 1) * h_l] = u
    return m


def _upsample_cols(wsp, c):
    """Column (w-axis) 2x bilinear upsample operator: (W*C, 2W*C)."""
    u = _bilinear_1d(wsp)
    ucol = np.zeros((wsp * c, 2 * wsp * c), np.float32)
    for w2 in range(2 * wsp):
        for wi in range(wsp):
            if u[w2, wi] != 0.0:
                for ch in range(c):
                    ucol[wi * c + ch, w2 * c + ch] = u[w2, wi]
    return ucol


def _row_avg_op(nb, h_l):
    """(Nb, Nb*h_l) per-sample row-mean operator (classification head h-pool)."""
    m = np.zeros((nb, nb * h_l), np.float32)
    for s in range(nb):
        m[s, s * h_l:(s + 1) * h_l] = 1.0 / h_l
    return m


# ----------------------------- parameters -----------------------------

def init_params(seed, base_channels, num_classes, hidden_dim, spatial, nb):
    """Build the packed bf16 operator buffer.

    Returns (wbuf [rows,128] bf16, index {name: (row_off, rows, cols)},
    flops_per_grid_step)."""
    assert spatial % 8 == 0
    assert 1 <= nb and nb * spatial <= 128
    B, H, W = base_channels, spatial, spatial
    rng = np.random.default_rng(seed)
    bn_scale = np.float32(1.0 / np.sqrt(1.0 + BN_EPS))   # eval BN, default stats

    def conv_w(cin, cout, k):
        fan = k * k * cin
        w = (rng.standard_normal((k, k, cin, cout)) / np.sqrt(fan)).astype(np.float32)
        b = (0.01 * rng.standard_normal((cout,))).astype(np.float32)
        return w, b

    def lin_w(cin, cout):
        w = (rng.standard_normal((cin, cout)) / np.sqrt(cin)).astype(np.float32)
        b = (0.01 * rng.standard_normal((cout,))).astype(np.float32)
        return w, b

    pk = _Packer()
    flops = 0

    # Row-shift operators, shared per pyramid level (block-diag over nb samples).
    for h_l in (H, H // 2, H // 4, H // 8):
        su, sd = _row_shift_ops(nb, h_l)
        pk.add(f"su{h_l}", su)
        pk.add(f"sd{h_l}", sd)

    def add_conv(name, h_l, wsp_l, in_blocks, cout, bn):
        nonlocal flops
        cin = sum(in_blocks)
        w, b = conv_w(cin, cout, 3)
        scale = bn_scale if bn else np.float32(1.0)
        m, brow = _conv3x3_op(w * scale, b * scale, wsp_l, in_blocks)
        pk.add(f"{name}_m", m)
        pk.add(f"{name}_b", brow)
        r, k, n_out = nb * h_l, wsp_l * cin, wsp_l * cout
        flops += 2 * (2 * r * r * k)        # two row-shift matmuls
        flops += 2 * r * (3 * k) * n_out    # fused ky-stacked conv matmul

    def add_pool(name, h_l, wsp_l, c):
        nonlocal flops
        pra, prb = _row_pool_ops(nb, h_l)
        pca, pcb = _pool_cols(wsp_l, c)
        pk.add(f"{name}_pra", pra)
        pk.add(f"{name}_prb", prb)
        pk.add(f"{name}_pca", pca)
        pk.add(f"{name}_pcb", pcb)
        r, k = nb * h_l, wsp_l * c
        flops += 2 * 2 * (r // 2) * r * k
        flops += 2 * 2 * (r // 2) * k * (k // 2)

    def add_upsample(name, h_l, wsp_l, c):
        nonlocal flops
        pk.add(f"{name}_urow", _row_upsample_op(nb, h_l))
        pk.add(f"{name}_ucol", _upsample_cols(wsp_l, c))
        r, k = nb * h_l, wsp_l * c
        flops += 2 * (2 * r) * r * k
        flops += 2 * (2 * r) * k * (2 * k)

    # ---- encoder ----
    add_conv("d1", H, W, [1], B, bn=True)
    add_pool("d1", H, W, B)
    add_conv("d2", H // 2, W // 2, [B], 2 * B, bn=True)
    add_pool("d2", H // 2, W // 2, 2 * B)
    add_conv("d3", H // 4, W // 4, [2 * B], 4 * B, bn=True)
    add_pool("d3", H // 4, W // 4, 4 * B)
    # ---- bottleneck: plain conv, no BN, no ReLU ----
    add_conv("bneck", H // 8, W // 8, [4 * B], 4 * B, bn=False)
    # ---- decoder (up2/up3 consume lane-concat of [upsampled, skip]) ----
    add_conv("u1", H // 8, W // 8, [4 * B], 2 * B, bn=True)
    add_upsample("u1", H // 8, W // 8, 2 * B)
    add_conv("u2", H // 4, W // 4, [2 * B, 2 * B], B, bn=True)
    add_upsample("u2", H // 4, W // 4, B)
    add_conv("u3", H // 2, W // 2, [B, B], B, bn=True)
    add_upsample("u3", H // 2, W // 2, B)
    # ---- final 1x1 conv ----
    w, b = lin_w(B, 1)
    m, brow = _conv1x1_op(w, b, W)
    pk.add("out_m", m)
    pk.add("out_b", brow)
    flops += 2 * (nb * H) * (W * B) * W

    # ---- classification head (consumes skip3 == d3, as in the reference) ----
    # AdaptiveAvgPool2d commutes with the 1x1 conv_reduce: the w-mean is folded
    # into its weights host-side, the per-sample h-mean is a row-operator matmul.
    h3, w3 = H // 8, W // 8
    pk.add("head_avg", _row_avg_op(nb, h3))
    wc, bc = lin_w(4 * B, 128)
    avg_w = np.zeros((w3 * 4 * B, 4 * B), np.float32)
    for wi in range(w3):
        for c in range(4 * B):
            avg_w[wi * 4 * B + c, c] = 1.0 / w3
    pk.add("head_wc", avg_w @ wc)
    pk.add("head_bc", bc[None, :])
    w2, b2 = lin_w(128, hidden_dim)
    pk.add("head_w2", w2)
    pk.add("head_b2", b2[None, :])
    wo, bo = lin_w(hidden_dim, num_classes)
    wo_pad = np.zeros((hidden_dim, LANES), np.float32)
    wo_pad[:, :num_classes] = wo
    bo_pad = np.zeros((1, LANES), np.float32)
    bo_pad[0, :num_classes] = bo
    pk.add("head_wo", wo_pad)            # padded to 128 lanes -> lane-dense store
    pk.add("head_bo", bo_pad)
    flops += 2 * nb * (nb * h3) * (w3 * 4 * B)
    flops += 2 * nb * (w3 * 4 * B) * 128
    flops += 2 * nb * 128 * hidden_dim
    flops += 2 * nb * hidden_dim * LANES

    wbuf_np, index = pk.finalize()
    return jnp.asarray(wbuf_np, dtype=jnp.bfloat16), index, int(flops)


# ----------------------------- fused forward -----------------------------

def build_forward(index, *, nb, spatial, num_classes, flops_per_step):
    H = W = spatial

    def mm(a, b):
        # bf16 MXU matmul with f32 accumulation.
        return jnp.dot(a.astype(jnp.bfloat16), b.astype(jnp.bfloat16),
                       preferred_element_type=jnp.float32)

    def kernel(x_ref, w_ref, logits_ref, unet_ref):
        def op(name):
            off, r, c = index[name]
            return w_ref[off:off + r, :c]      # static slice of the packed buffer

        def conv3x3(x, name, h_l, relu):
            xu = mm(op(f"su{h_l}"), x)                      # x[h-1] (0 at sample top)
            xd = mm(op(f"sd{h_l}"), x)                      # x[h+1] (0 at sample bottom)
            xa = jnp.concatenate([xu, x, xd], axis=1)       # ky = 0,1,2 along lanes
            y = mm(xa, op(f"{name}_m")) + op(f"{name}_b").astype(jnp.float32)
            return jnp.maximum(y, 0.0) if relu else y

        def maxpool2(y, name):
            rp = jnp.maximum(mm(op(f"{name}_pra"), y),
                             mm(op(f"{name}_prb"), y))      # 2x1 row max
            return jnp.maximum(mm(rp, op(f"{name}_pca")),
                               mm(rp, op(f"{name}_pcb")))   # 1x2 col max

        def upsample2(y, name):
            yr = mm(op(f"{name}_urow"), y)                  # bilinear over rows
            return mm(yr, op(f"{name}_ucol"))               # bilinear over cols

        x = x_ref[...]                                      # (Nb*H, W), f32

        # ---- encoder ----
        y = conv3x3(x, "d1", H, True)
        d1 = maxpool2(y, "d1")                              # skip1
        y = conv3x3(d1, "d2", H // 2, True)
        d2 = maxpool2(y, "d2")                              # skip2
        y = conv3x3(d2, "d3", H // 4, True)
        d3 = maxpool2(y, "d3")                              # skip3 (head input)

        # ---- bottleneck (plain conv) ----
        bt = conv3x3(d3, "bneck", H // 8, False)

        # ---- decoder ----
        y = conv3x3(bt, "u1", H // 8, True)
        u1 = upsample2(y, "u1")
        y = conv3x3(jnp.concatenate([u1, d2], axis=1), "u2", H // 4, True)
        u2 = upsample2(y, "u2")
        y = conv3x3(jnp.concatenate([u2, d1], axis=1), "u3", H // 2, True)
        u3 = upsample2(y, "u3")                             # (Nb*H, W*B)

        # ---- final 1x1 conv, stored as (Nb*H, W) rows (NCHW reshape outside) ----
        unet_ref[...] = mm(u3, op("out_m")) + op("out_b").astype(jnp.float32)

        # ---- classification head on skip3 ----
        pooled = mm(op("head_avg"), d3)                     # (Nb, W3*4B)
        h1 = mm(pooled, op("head_wc")) + op("head_bc").astype(jnp.float32)
        h2 = jnp.maximum(mm(h1, op("head_w2"))
                         + op("head_b2").astype(jnp.float32), 0.0)
        logits_ref[0] = mm(h2, op("head_wo")) + op("head_bo").astype(jnp.float32)

    def forward(wbuf, x_nchw, t):
        del t  # `t` is unused in SimpleUNet.forward, as in the reference module
        n, cin, hh, ww = x_nchw.shape
        assert cin == 1 and hh == H and ww == W and n % nb == 0
        g = n // nb
        x2d = x_nchw.reshape(n * H, W).astype(jnp.float32)

        bytes_accessed = (4 * x2d.size
                          + wbuf.size * wbuf.dtype.itemsize
                          + 4 * n * LANES + 4 * n * H * W)
        cost = pl.CostEstimate(flops=flops_per_step * g, transcendentals=0,
                               bytes_accessed=int(bytes_accessed))

        logits3, unet2d = pl.pallas_call(
            kernel,
            grid=(g,),
            in_specs=[pl.BlockSpec((nb * H, W), lambda i: (i, 0)),
                      pl.BlockSpec(wbuf.shape, lambda i: (0, 0))],
            out_specs=(pl.BlockSpec((1, nb, LANES), lambda i: (i, 0, 0)),
                       pl.BlockSpec((nb * H, W), lambda i: (i, 0))),
            out_shape=(jax.ShapeDtypeStruct((g, nb, LANES), jnp.float32),
                       jax.ShapeDtypeStruct((n * H, W), jnp.float32)),
            compiler_params=pltpu.CompilerParams(
                dimension_semantics=("parallel",)),
            cost_estimate=cost,
        )(x2d, wbuf)

        logits = logits3.reshape(n, LANES)[:, :num_classes]
        unet_out = unet2d.reshape(n, 1, H, W)               # NCHW (Cout=1)
        return logits, unet_out

    return jax.jit(forward)


# ----------------------------- main -----------------------------

if __name__ == "__main__":
    base_channels, num_classes, hidden_dim = 4, 10, 32
    H = W = 16
    N = 2

    # Samples per grid step: largest divisor of N that keeps Nb*H <= 128 sublanes
    # (fills the MXU M dimension; for N >= 2*(128//H) the grid is also even so
    # both v7x TensorCores receive work under dimension_semantics=("parallel",)).
    NB = 1
    for d in range(1, N + 1):
        if N % d == 0 and d * H <= 128:
            NB = d

    wbuf, index, flops_per_step = init_params(
        0, base_channels, num_classes, hidden_dim, W, NB)
    fwd = build_forward(index, nb=NB, spatial=W, num_classes=num_classes,
                        flops_per_step=flops_per_step)

    key = jax.random.PRNGKey(0)
    kx, kt = jax.random.split(key)
    x = jax.random.normal(kx, (N, 1, H, W), jnp.float32)    # NCHW, like the module
    t = jax.random.randint(kt, (N,), 0, 1000)

    logits, unet_out = fwd(wbuf, x, t)
    jax.block_until_ready((logits, unet_out))

    assert logits.shape == (N, num_classes)
    assert unet_out.shape == (N, 1, H, W)
    assert bool(jnp.all(jnp.isfinite(logits)))
    assert bool(jnp.all(jnp.isfinite(unet_out)))
    print("KERNEL_OK")
</pallas_src>

<mosaic_0001>
module attributes {stable_mosaic.version = 11 : i64} {
  func.func @kernel(%arg0: i32, %arg1: memref<32x16xf32, #tpu.memory_space<vmem>>, %arg2: memref<1864x128xbf16, #tpu.memory_space<vmem>>, %arg3: memref<1x2x128xf32, #tpu.memory_space<vmem>>, %arg4: memref<32x16xf32, #tpu.memory_space<vmem>>) attributes {dimension_semantics = [#tpu.dimension_semantics<parallel>], iteration_bounds = array<i64: 1>, scalar_prefetch = 0 : i64, scratch_operands = 0 : i64, tpu.core_type = #tpu.core_type<tc>, window_params = [{transform_indices = @transform_0, window_bounds = array<i64: 32, 16>}, {pipeline_mode = #tpu.pipeline_mode<synchronous>, transform_indices = @transform_1, window_bounds = array<i64: 1864, 128>}, {transform_indices = @transform_2, window_bounds = array<i64: 1, 2, 128>}, {transform_indices = @transform_3, window_bounds = array<i64: 32, 16>}]} {
    %c0 = arith.constant 0 : index
    %c0_0 = arith.constant 0 : index
    %0 = vector.load %arg1[%c0, %c0_0] : memref<32x16xf32, #tpu.memory_space<vmem>>, vector<32x16xf32>
    %c0_1 = arith.constant 0 : index
    %c0_2 = arith.constant 0 : index
    %1 = vector.load %arg2[%c0_1, %c0_2] : memref<1864x128xbf16, #tpu.memory_space<vmem>>, vector<32x32xbf16>
    %2 = arith.truncf %0 : vector<32x16xf32> to vector<32x16xbf16>
    %cst = arith.constant dense<0.000000e+00> : vector<32x16xf32>
    %3 = tpu.matmul %1, %2, %cst {dimension_numbers = #tpu.dot_dimension_numbers<[1], [0], [0], [1], [0, 0, 1, 1], [], []>} : vector<32x32xbf16>, vector<32x16xbf16>, vector<32x16xf32> -> vector<32x16xf32>
    %c32 = arith.constant 32 : index
    %c0_3 = arith.constant 0 : index
    %4 = vector.load %arg2[%c32, %c0_3] : memref<1864x128xbf16, #tpu.memory_space<vmem>>, vector<32x32xbf16>
    %5 = arith.truncf %0 : vector<32x16xf32> to vector<32x16xbf16>
    %cst_4 = arith.constant dense<0.000000e+00> : vector<32x16xf32>
    %6 = tpu.matmul %4, %5, %cst_4 {dimension_numbers = #tpu.dot_dimension_numbers<[1], [0], [0], [1], [0, 0, 1, 1], [], []>} : vector<32x32xbf16>, vector<32x16xbf16>, vector<32x16xf32> -> vector<32x16xf32>
    %7 = tpu.concatenate %3, %0, %6 in 1 : vector<32x16xf32>, vector<32x16xf32>, vector<32x16xf32> -> vector<32x48xf32>
    %c128 = arith.constant 128 : index
    %c0_5 = arith.constant 0 : index
    %8 = vector.load %arg2[%c128, %c0_5] : memref<1864x128xbf16, #tpu.memory_space<vmem>>, vector<48x64xbf16>
    %9 = arith.truncf %7 : vector<32x48xf32> to vector<32x48xbf16>
    %cst_6 = arith.constant dense<0.000000e+00> : vector<32x64xf32>
    %10 = tpu.matmul %9, %8, %cst_6 {dimension_numbers = #tpu.dot_dimension_numbers<[1], [0], [0], [1], [0, 0, 1, 1], [], []>} : vector<32x48xbf16>, vector<48x64xbf16>, vector<32x64xf32> -> vector<32x64xf32>
    %c176 = arith.constant 176 : index
    %c0_7 = arith.constant 0 : index
    %11 = vector.load %arg2[%c176, %c0_7] : memref<1864x128xbf16, #tpu.memory_space<vmem>>, vector<1x64xbf16>
    %12 = arith.extf %11 : vector<1x64xbf16> to vector<1x64xf32>
    %13 = vector.broadcast %12 : vector<1x64xf32> to vector<32x64xf32>
    %14 = arith.addf %10, %13 : vector<32x64xf32>
    %cst_8 = arith.constant 0.000000e+00 : f32
    %15 = vector.broadcast %cst_8 : f32 to vector<32x64xf32>
    %16 = arith.maximumf %14, %15 : vector<32x64xf32>
    %c184 = arith.constant 184 : index
    %c0_9 = arith.constant 0 : index
    %17 = vector.load %arg2[%c184, %c0_9] : memref<1864x128xbf16, #tpu.memory_space<vmem>>, vector<16x32xbf16>
    %18 = arith.truncf %16 : vector<32x64xf32> to vector<32x64xbf16>
    %cst_10 = arith.constant dense<0.000000e+00> : vector<16x64xf32>
    %19 = tpu.matmul %17, %18, %cst_10 {dimension_numbers = #tpu.dot_dimension_numbers<[1], [0], [0], [1], [0, 0, 1, 1], [], []>} : vector<16x32xbf16>, vector<32x64xbf16>, vector<16x64xf32> -> vector<16x64xf32>
    %c200 = arith.constant 200 : index
    %c0_11 = arith.constant 0 : index
    %20 = vector.load %arg2[%c200, %c0_11] : memref<1864x128xbf16, #tpu.memory_space<vmem>>, vector<16x32xbf16>
    %21 = arith.truncf %16 : vector<32x64xf32> to vector<32x64xbf16>
    %cst_12 = arith.constant dense<0.000000e+00> : vector<16x64xf32>
    %22 = tpu.matmul %20, %21, %cst_12 {dimension_numbers = #tpu.dot_dimension_numbers<[1], [0], [0], [1], [0, 0, 1, 1], [], []>} : vector<16x32xbf16>, vector<32x64xbf16>, vector<16x64xf32> -> vector<16x64xf32>
    %23 = arith.maximumf %19, %22 : vector<16x64xf32>
    %c216 = arith.constant 216 : index
    %c0_13 = arith.constant 0 : index
    %24 = vector.load %arg2[%c216, %c0_13] : memref<1864x128xbf16, #tpu.memory_space<vmem>>, vector<64x32xbf16>
    %25 = arith.truncf %23 : vector<16x64xf32> to vector<16x64xbf16>
    %cst_14 = arith.constant dense<0.000000e+00> : vector<16x32xf32>
    %26 = tpu.matmul %25, %24, %cst_14 {dimension_numbers = #tpu.dot_dimension_numbers<[1], [0], [0], [1], [0, 0, 1, 1], [], []>} : vector<16x64xbf16>, vector<64x32xbf16>, vector<16x32xf32> -> vector<16x32xf32>
    %c280 = arith.constant 280 : index
    %c0_15 = arith.constant 0 : index
    %27 = vector.load %arg2[%c280, %c0_15] : memref<1864x128xbf16, #tpu.memory_space<vmem>>, vector<64x32xbf16>
    %28 = arith.truncf %23 : vector<16x64xf32> to vector<16x64xbf16>
    %cst_16 = arith.constant dense<0.000000e+00> : vector<16x32xf32>
    %29 = tpu.matmul %28, %27, %cst_16 {dimension_numbers = #tpu.dot_dimension_numbers<[1], [0], [0], [1], [0, 0, 1, 1], [], []>} : vector<16x64xbf16>, vector<64x32xbf16>, vector<16x32xf32> -> vector<16x32xf32>
    %30 = arith.maximumf %26, %29 : vector<16x32xf32>
    %c64 = arith.constant 64 : index
    %c0_17 = arith.constant 0 : index
    %31 = vector.load %arg2[%c64, %c0_17] : memref<1864x128xbf16, #tpu.memory_space<vmem>>, vector<16x16xbf16>
    %32 = arith.truncf %30 : vector<16x32xf32> to vector<16x32xbf16>
    %cst_18 = arith.constant dense<0.000000e+00> : vector<16x32xf32>
    %33 = tpu.matmul %31, %32, %cst_18 {dimension_numbers = #tpu.dot_dimension_numbers<[1], [0], [0], [1], [0, 0, 1, 1], [], []>} : vector<16x16xbf16>, vector<16x32xbf16>, vector<16x32xf32> -> vector<16x32xf32>
    %c80 = arith.constant 80 : index
    %c0_19 = arith.constant 0 : index
    %34 = vector.load %arg2[%c80, %c0_19] : memref<1864x128xbf16, #tpu.memory_space<vmem>>, vector<16x16xbf16>
    %35 = arith.truncf %30 : vector<16x32xf32> to vector<16x32xbf16>
    %cst_20 = arith.constant dense<0.000000e+00> : vector<16x32xf32>
    %36 = tpu.matmul %34, %35, %cst_20 {dimension_numbers = #tpu.dot_dimension_numbers<[1], [0], [0], [1], [0, 0, 1, 1], [], []>} : vector<16x16xbf16>, vector<16x32xbf16>, vector<16x32xf32> -> vector<16x32xf32>
    %37 = tpu.concatenate %33, %30, %36 in 1 : vector<16x32xf32>, vector<16x32xf32>, vector<16x32xf32> -> vector<16x96xf32>
    %c344 = arith.constant 344 : index
    %c0_21 = arith.constant 0 : index
    %38 = vector.load %arg2[%c344, %c0_21] : memref<1864x128xbf16, #tpu.memory_space<vmem>>, vector<96x64xbf16>
    %39 = arith.truncf %37 : vector<16x96xf32> to vector<16x96xbf16>
    %cst_22 = arith.constant dense<0.000000e+00> : vector<16x64xf32>
    %40 = tpu.matmul %39, %38, %cst_22 {dimension_numbers = #tpu.dot_dimension_numbers<[1], [0], [0], [1], [0, 0, 1, 1], [], []>} : vector<16x96xbf16>, vector<96x64xbf16>, vector<16x64xf32> -> vector<16x64xf32>
    %c440 = arith.constant 440 : index
    %c0_23 = arith.constant 0 : index
    %41 = vector.load %arg2[%c440, %c0_23] : memref<1864x128xbf16, #tpu.memory_space<vmem>>, vector<1x64xbf16>
    %42 = arith.extf %41 : vector<1x64xbf16> to vector<1x64xf32>
    %43 = vector.broadcast %42 : vector<1x64xf32> to vector<16x64xf32>
    %44 = arith.addf %40, %43 : vector<16x64xf32>
    %cst_24 = arith.constant 0.000000e+00 : f32
    %45 = vector.broadcast %cst_24 : f32 to vector<16x64xf32>
    %46 = arith.maximumf %44, %45 : vector<16x64xf32>
    %c448 = arith.constant 448 : index
    %c0_25 = arith.constant 0 : index
    %47 = vector.load %arg2[%c448, %c0_25] : memref<1864x128xbf16, #tpu.memory_space<vmem>>, vector<8x16xbf16>
    %48 = arith.truncf %46 : vector<16x64xf32> to vector<16x64xbf16>
    %cst_26 = arith.constant dense<0.000000e+00> : vector<8x64xf32>
    %49 = tpu.matmul %47, %48, %cst_26 {dimension_numbers = #tpu.dot_dimension_numbers<[1], [0], [0], [1], [0, 0, 1, 1], [], []>} : vector<8x16xbf16>, vector<16x64xbf16>, vector<8x64xf32> -> vector<8x64xf32>
    %c456 = arith.constant 456 : index
    %c0_27 = arith.constant 0 : index
    %50 = vector.load %arg2[%c456, %c0_27] : memref<1864x128xbf16, #tpu.memory_space<vmem>>, vector<8x16xbf16>
    %51 = arith.truncf %46 : vector<16x64xf32> to vector<16x64xbf16>
    %cst_28 = arith.constant dense<0.000000e+00> : vector<8x64xf32>
    %52 = tpu.matmul %50, %51, %cst_28 {dimension_numbers = #tpu.dot_dimension_numbers<[1], [0], [0], [1], [0, 0, 1, 1], [], []>} : vector<8x16xbf16>, vector<16x64xbf16>, vector<8x64xf32> -> vector<8x64xf32>
    %53 = arith.maximumf %49, %52 : vector<8x64xf32>
    %c464 = arith.constant 464 : index
    %c0_29 = arith.constant 0 : index
    %54 = vector.load %arg2[%c464, %c0_29] : memref<1864x128xbf16, #tpu.memory_space<vmem>>, vector<64x32xbf16>
    %55 = arith.truncf %53 : vector<8x64xf32> to vector<8x64xbf16>
    %cst_30 = arith.constant dense<0.000000e+00> : vector<8x32xf32>
    %56 = tpu.matmul %55, %54, %cst_30 {dimension_numbers = #tpu.dot_dimension_numbers<[1], [0], [0], [1], [0, 0, 1, 1], [], []>} : vector<8x64xbf16>, vector<64x32xbf16>, vector<8x32xf32> -> vector<8x32xf32>
    %c528 = arith.constant 528 : index
    %c0_31 = arith.constant 0 : index
    %57 = vector.load %arg2[%c528, %c0_31] : memref<1864x128xbf16, #tpu.memory_space<vmem>>, vector<64x32xbf16>
    %58 = arith.truncf %53 : vector<8x64xf32> to vector<8x64xbf16>
    %cst_32 = arith.constant dense<0.000000e+00> : vector<8x32xf32>
    %59 = tpu.matmul %58, %57, %cst_32 {dimension_numbers = #tpu.dot_dimension_numbers<[1], [0], [0], [1], [0, 0, 1, 1], [], []>} : vector<8x64xbf16>, vector<64x32xbf16>, vector<8x32xf32> -> vector<8x32xf32>
    %60 = arith.maximumf %56, %59 : vector<8x32xf32>
    %c96 = arith.constant 96 : index
    %c0_33 = arith.constant 0 : index
    %61 = vector.load %arg2[%c96, %c0_33] : memref<1864x128xbf16, #tpu.memory_space<vmem>>, vector<8x8xbf16>
    %62 = arith.truncf %60 : vector<8x32xf32> to vector<8x32xbf16>
    %cst_34 = arith.constant dense<0.000000e+00> : vector<8x32xf32>
    %63 = tpu.matmul %61, %62, %cst_34 {dimension_numbers = #tpu.dot_dimension_numbers<[1], [0], [0], [1], [0, 0, 1, 1], [], []>} : vector<8x8xbf16>, vector<8x32xbf16>, vector<8x32xf32> -> vector<8x32xf32>
    %c104 = arith.constant 104 : index
    %c0_35 = arith.constant 0 : index
    %64 = vector.load %arg2[%c104, %c0_35] : memref<1864x128xbf16, #tpu.memory_space<vmem>>, vector<8x8xbf16>
    %65 = arith.truncf %60 : vector<8x32xf32> to vector<8x32xbf16>
    %cst_36 = arith.constant dense<0.000000e+00> : vector<8x32xf32>
    %66 = tpu.matmul %64, %65, %cst_36 {dimension_numbers = #tpu.dot_dimension_numbers<[1], [0], [0], [1], [0, 0, 1, 1], [], []>} : vector<8x8xbf16>, vector<8x32xbf16>, vector<8x32xf32> -> vector<8x32xf32>
    %67 = tpu.concatenate %63, %60, %66 in 1 : vector<8x32xf32>, vector<8x32xf32>, vector<8x32xf32> -> vector<8x96xf32>
    %c592 = arith.constant 592 : index
    %c0_37 = arith.constant 0 : index
    %68 = vector.load %arg2[%c592, %c0_37] : memref<1864x128xbf16, #tpu.memory_space<vmem>>, vector<96x64xbf16>
    %69 = arith.truncf %67 : vector<8x96xf32> to vector<8x96xbf16>
    %cst_38 = arith.constant dense<0.000000e+00> : vector<8x64xf32>
    %70 = tpu.matmul %69, %68, %cst_38 {dimension_numbers = #tpu.dot_dimension_numbers<[1], [0], [0], [1], [0, 0, 1, 1], [], []>} : vector<8x96xbf16>, vector<96x64xbf16>, vector<8x64xf32> -> vector<8x64xf32>
    %c688 = arith.constant 688 : index
    %c0_39 = arith.constant 0 : index
    %71 = vector.load %arg2[%c688, %c0_39] : memref<1864x128xbf16, #tpu.memory_space<vmem>>, vector<1x64xbf16>
    %72 = arith.extf %71 : vector<1x64xbf16> to vector<1x64xf32>
    %73 = vector.broadcast %72 : vector<1x64xf32> to vector<8x64xf32>
    %74 = arith.addf %70, %73 : vector<8x64xf32>
    %cst_40 = arith.constant 0.000000e+00 : f32
    %75 = vector.broadcast %cst_40 : f32 to vector<8x64xf32>
    %76 = arith.maximumf %74, %75 : vector<8x64xf32>
    %c696 = arith.constant 696 : index
    %c0_41 = arith.constant 0 : index
    %77 = vector.load %arg2[%c696, %c0_41] : memref<1864x128xbf16, #tpu.memory_space<vmem>>, vector<4x8xbf16>
    %78 = arith.truncf %76 : vector<8x64xf32> to vector<8x64xbf16>
    %cst_42 = arith.constant dense<0.000000e+00> : vector<4x64xf32>
    %79 = tpu.matmul %77, %78, %cst_42 {dimension_numbers = #tpu.dot_dimension_numbers<[1], [0], [0], [1], [0, 0, 1, 1], [], []>} : vector<4x8xbf16>, vector<8x64xbf16>, vector<4x64xf32> -> vector<4x64xf32>
    %c704 = arith.constant 704 : index
    %c0_43 = arith.constant 0 : index
    %80 = vector.load %arg2[%c704, %c0_43] : memref<1864x128xbf16, #tpu.memory_space<vmem>>, vector<4x8xbf16>
    %81 = arith.truncf %76 : vector<8x64xf32> to vector<8x64xbf16>
    %cst_44 = arith.constant dense<0.000000e+00> : vector<4x64xf32>
    %82 = tpu.matmul %80, %81, %cst_44 {dimension_numbers = #tpu.dot_dimension_numbers<[1], [0], [0], [1], [0, 0, 1, 1], [], []>} : vector<4x8xbf16>, vector<8x64xbf16>, vector<4x64xf32> -> vector<4x64xf32>
    %83 = arith.maximumf %79, %82 : vector<4x64xf32>
    %c712 = arith.constant 712 : index
    %c0_45 = arith.constant 0 : index
    %84 = vector.load %arg2[%c712, %c0_45] : memref<1864x128xbf16, #tpu.memory_space<vmem>>, vector<64x32xbf16>
    %85 = arith.truncf %83 : vector<4x64xf32> to vector<4x64xbf16>
    %cst_46 = arith.constant dense<0.000000e+00> : vector<4x32xf32>
    %86 = tpu.matmul %85, %84, %cst_46 {dimension_numbers = #tpu.dot_dimension_numbers<[1], [0], [0], [1], [0, 0, 1, 1], [], []>} : vector<4x64xbf16>, vector<64x32xbf16>, vector<4x32xf32> -> vector<4x32xf32>
    %c776 = arith.constant 776 : index
    %c0_47 = arith.constant 0 : index
    %87 = vector.load %arg2[%c776, %c0_47] : memref<1864x128xbf16, #tpu.memory_space<vmem>>, vector<64x32xbf16>
    %88 = arith.truncf %83 : vector<4x64xf32> to vector<4x64xbf16>
    %cst_48 = arith.constant dense<0.000000e+00> : vector<4x32xf32>
    %89 = tpu.matmul %88, %87, %cst_48 {dimension_numbers = #tpu.dot_dimension_numbers<[1], [0], [0], [1], [0, 0, 1, 1], [], []>} : vector<4x64xbf16>, vector<64x32xbf16>, vector<4x32xf32> -> vector<4x32xf32>
    %90 = arith.maximumf %86, %89 : vector<4x32xf32>
    %c112 = arith.constant 112 : index
    %c0_49 = arith.constant 0 : index
    %91 = vector.load %arg2[%c112, %c0_49] : memref<1864x128xbf16, #tpu.memory_space<vmem>>, vector<4x4xbf16>
    %92 = arith.truncf %90 : vector<4x32xf32> to vector<4x32xbf16>
    %cst_50 = arith.constant dense<0.000000e+00> : vector<4x32xf32>
    %93 = tpu.matmul %91, %92, %cst_50 {dimension_numbers = #tpu.dot_dimension_numbers<[1], [0], [0], [1], [0, 0, 1, 1], [], []>} : vector<4x4xbf16>, vector<4x32xbf16>, vector<4x32xf32> -> vector<4x32xf32>
    %c120 = arith.constant 120 : index
    %c0_51 = arith.constant 0 : index
    %94 = vector.load %arg2[%c120, %c0_51] : memref<1864x128xbf16, #tpu.memory_space<vmem>>, vector<4x4xbf16>
    %95 = arith.truncf %90 : vector<4x32xf32> to vector<4x32xbf16>
    %cst_52 = arith.constant dense<0.000000e+00> : vector<4x32xf32>
    %96 = tpu.matmul %94, %95, %cst_52 {dimension_numbers = #tpu.dot_dimension_numbers<[1], [0], [0], [1], [0, 0, 1, 1], [], []>} : vector<4x4xbf16>, vector<4x32xbf16>, vector<4x32xf32> -> vector<4x32xf32>
    %97 = tpu.concatenate %93, %90, %96 in 1 : vector<4x32xf32>, vector<4x32xf32>, vector<4x32xf32> -> vector<4x96xf32>
    %c840 = arith.constant 840 : index
    %c0_53 = arith.constant 0 : index
    %98 = vector.load %arg2[%c840, %c0_53] : memref<1864x128xbf16, #tpu.memory_space<vmem>>, vector<96x32xbf16>
    %99 = arith.truncf %97 : vector<4x96xf32> to vector<4x96xbf16>
    %cst_54 = arith.constant dense<0.000000e+00> : vector<4x32xf32>
    %100 = tpu.matmul %99, %98, %cst_54 {dimension_numbers = #tpu.dot_dimension_numbers<[1], [0], [0], [1], [0, 0, 1, 1], [], []>} : vector<4x96xbf16>, vector<96x32xbf16>, vector<4x32xf32> -> vector<4x32xf32>
    %c936 = arith.constant 936 : index
    %c0_55 = arith.constant 0 : index
    %101 = vector.load %arg2[%c936, %c0_55] : memref<1864x128xbf16, #tpu.memory_space<vmem>>, vector<1x32xbf16>
    %102 = arith.extf %101 : vector<1x32xbf16> to vector<1x32xf32>
    %103 = vector.broadcast %102 : vector<1x32xf32> to vector<4x32xf32>
    %104 = arith.addf %100, %103 : vector<4x32xf32>
    %c112_56 = arith.constant 112 : index
    %c0_57 = arith.constant 0 : index
    %105 = vector.load %arg2[%c112_56, %c0_57] : memref<1864x128xbf16, #tpu.memory_space<vmem>>, vector<4x4xbf16>
    %106 = arith.truncf %104 : vector<4x32xf32> to vector<4x32xbf16>
    %cst_58 = arith.constant dense<0.000000e+00> : vector<4x32xf32>
    %107 = tpu.matmul %105, %106, %cst_58 {dimension_numbers = #tpu.dot_dimension_numbers<[1], [0], [0], [1], [0, 0, 1, 1], [], []>} : vector<4x4xbf16>, vector<4x32xbf16>, vector<4x32xf32> -> vector<4x32xf32>
    %c120_59 = arith.constant 120 : index
    %c0_60 = arith.constant 0 : index
    %108 = vector.load %arg2[%c120_59, %c0_60] : memref<1864x128xbf16, #tpu.memory_space<vmem>>, vector<4x4xbf16>
    %109 = arith.truncf %104 : vector<4x32xf32> to vector<4x32xbf16>
    %cst_61 = arith.constant dense<0.000000e+00> : vector<4x32xf32>
    %110 = tpu.matmul %108, %109, %cst_61 {dimension_numbers = #tpu.dot_dimension_numbers<[1], [0], [0], [1], [0, 0, 1, 1], [], []>} : vector<4x4xbf16>, vector<4x32xbf16>, vector<4x32xf32> -> vector<4x32xf32>
    %111 = tpu.concatenate %107, %104, %110 in 1 : vector<4x32xf32>, vector<4x32xf32>, vector<4x32xf32> -> vector<4x96xf32>
    %c944 = arith.constant 944 : index
    %c0_62 = arith.constant 0 : index
    %112 = vector.load %arg2[%c944, %c0_62] : memref<1864x128xbf16, #tpu.memory_space<vmem>>, vector<96x16xbf16>
    %113 = arith.truncf %111 : vector<4x96xf32> to vector<4x96xbf16>
    %cst_63 = arith.constant dense<0.000000e+00> : vector<4x16xf32>
    %114 = tpu.matmul %113, %112, %cst_63 {dimension_numbers = #tpu.dot_dimension_numbers<[1], [0], [0], [1], [0, 0, 1, 1], [], []>} : vector<4x96xbf16>, vector<96x16xbf16>, vector<4x16xf32> -> vector<4x16xf32>
    %c1040 = arith.constant 1040 : index
    %c0_64 = arith.constant 0 : index
    %115 = vector.load %arg2[%c1040, %c0_64] : memref<1864x128xbf16, #tpu.memory_space<vmem>>, vector<1x16xbf16>
    %116 = arith.extf %115 : vector<1x16xbf16> to vector<1x16xf32>
    %117 = vector.broadcast %116 : vector<1x16xf32> to vector<4x16xf32>
    %118 = arith.addf %114, %117 : vector<4x16xf32>
    %cst_65 = arith.constant 0.000000e+00 : f32
    %119 = vector.broadcast %cst_65 : f32 to vector<4x16xf32>
    %120 = arith.maximumf %118, %119 : vector<4x16xf32>
    %c1048 = arith.constant 1048 : index
    %c0_66 = arith.constant 0 : index
    %121 = vector.load %arg2[%c1048, %c0_66] : memref<1864x128xbf16, #tpu.memory_space<vmem>>, vector<8x4xbf16>
    %122 = arith.truncf %120 : vector<4x16xf32> to vector<4x16xbf16>
    %cst_67 = arith.constant dense<0.000000e+00> : vector<8x16xf32>
    %123 = tpu.matmul %121, %122, %cst_67 {dimension_numbers = #tpu.dot_dimension_numbers<[1], [0], [0], [1], [0, 0, 1, 1], [], []>} : vector<8x4xbf16>, vector<4x16xbf16>, vector<8x16xf32> -> vector<8x16xf32>
    %c1056 = arith.constant 1056 : index
    %c0_68 = arith.constant 0 : index
    %124 = vector.load %arg2[%c1056, %c0_68] : memref<1864x128xbf16, #tpu.memory_space<vmem>>, vector<16x32xbf16>
    %125 = arith.truncf %123 : vector<8x16xf32> to vector<8x16xbf16>
    %cst_69 = arith.constant dense<0.000000e+00> : vector<8x32xf32>
    %126 = tpu.matmul %125, %124, %cst_69 {dimension_numbers = #tpu.dot_dimension_numbers<[1], [0], [0], [1], [0, 0, 1, 1], [], []>} : vector<8x16xbf16>, vector<16x32xbf16>, vector<8x32xf32> -> vector<8x32xf32>
    %127 = tpu.concatenate %126, %60 in 1 : vector<8x32xf32>, vector<8x32xf32> -> vector<8x64xf32>
    %c96_70 = arith.constant 96 : index
    %c0_71 = arith.constant 0 : index
    %128 = vector.load %arg2[%c96_70, %c0_71] : memref<1864x128xbf16, #tpu.memory_space<vmem>>, vector<8x8xbf16>
    %129 = arith.truncf %127 : vector<8x64xf32> to vector<8x64xbf16>
    %cst_72 = arith.constant dense<0.000000e+00> : vector<8x64xf32>
    %130 = tpu.matmul %128, %129, %cst_72 {dimension_numbers = #tpu.dot_dimension_numbers<[1], [0], [0], [1], [0, 0, 1, 1], [], []>} : vector<8x8xbf16>, vector<8x64xbf16>, vector<8x64xf32> -> vector<8x64xf32>
    %c104_73 = arith.constant 104 : index
    %c0_74 = arith.constant 0 : index
    %131 = vector.load %arg2[%c104_73, %c0_74] : memref<1864x128xbf16, #tpu.memory_space<vmem>>, vector<8x8xbf16>
    %132 = arith.truncf %127 : vector<8x64xf32> to vector<8x64xbf16>
    %cst_75 = arith.constant dense<0.000000e+00> : vector<8x64xf32>
    %133 = tpu.matmul %131, %132, %cst_75 {dimension_numbers = #tpu.dot_dimension_numbers<[1], [0], [0], [1], [0, 0, 1, 1], [], []>} : vector<8x8xbf16>, vector<8x64xbf16>, vector<8x64xf32> -> vector<8x64xf32>
    %134 = tpu.concatenate %130, %127, %133 in 1 : vector<8x64xf32>, vector<8x64xf32>, vector<8x64xf32> -> vector<8x192xf32>
    %c1072 = arith.constant 1072 : index
    %c0_76 = arith.constant 0 : index
    %135 = vector.load %arg2[%c1072, %c0_76] : memref<1864x128xbf16, #tpu.memory_space<vmem>>, vector<192x16xbf16>
    %136 = arith.truncf %134 : vector<8x192xf32> to vector<8x192xbf16>
    %cst_77 = arith.constant dense<0.000000e+00> : vector<8x16xf32>
    %137 = tpu.matmul %136, %135, %cst_77 {dimension_numbers = #tpu.dot_dimension_numbers<[1], [0], [0], [1], [0, 0, 1, 1], [], []>} : vector<8x192xbf16>, vector<192x16xbf16>, vector<8x16xf32> -> vector<8x16xf32>
    %c1264 = arith.constant 1264 : index
    %c0_78 = arith.constant 0 : index
    %138 = vector.load %arg2[%c1264, %c0_78] : memref<1864x128xbf16, #tpu.memory_space<vmem>>, vector<1x16xbf16>
    %139 = arith.extf %138 : vector<1x16xbf16> to vector<1x16xf32>
    %140 = vector.broadcast %139 : vector<1x16xf32> to vector<8x16xf32>
    %141 = arith.addf %137, %140 : vector<8x16xf32>
    %cst_79 = arith.constant 0.000000e+00 : f32
    %142 = vector.broadcast %cst_79 : f32 to vector<8x16xf32>
    %143 = arith.maximumf %141, %142 : vector<8x16xf32>
    %c1272 = arith.constant 1272 : index
    %c0_80 = arith.constant 0 : index
    %144 = vector.load %arg2[%c1272, %c0_80] : memref<1864x128xbf16, #tpu.memory_space<vmem>>, vector<16x8xbf16>
    %145 = arith.truncf %143 : vector<8x16xf32> to vector<8x16xbf16>
    %cst_81 = arith.constant dense<0.000000e+00> : vector<16x16xf32>
    %146 = tpu.matmul %144, %145, %cst_81 {dimension_numbers = #tpu.dot_dimension_numbers<[1], [0], [0], [1], [0, 0, 1, 1], [], []>} : vector<16x8xbf16>, vector<8x16xbf16>, vector<16x16xf32> -> vector<16x16xf32>
    %c1288 = arith.constant 1288 : index
    %c0_82 = arith.constant 0 : index
    %147 = vector.load %arg2[%c1288, %c0_82] : memref<1864x128xbf16, #tpu.memory_space<vmem>>, vector<16x32xbf16>
    %148 = arith.truncf %146 : vector<16x16xf32> to vector<16x16xbf16>
    %cst_83 = arith.constant dense<0.000000e+00> : vector<16x32xf32>
    %149 = tpu.matmul %148, %147, %cst_83 {dimension_numbers = #tpu.dot_dimension_numbers<[1], [0], [0], [1], [0, 0, 1, 1], [], []>} : vector<16x16xbf16>, vector<16x32xbf16>, vector<16x32xf32> -> vector<16x32xf32>
    %150 = tpu.concatenate %149, %30 in 1 : vector<16x32xf32>, vector<16x32xf32> -> vector<16x64xf32>
    %c64_84 = arith.constant 64 : index
    %c0_85 = arith.constant 0 : index
    %151 = vector.load %arg2[%c64_84, %c0_85] : memref<1864x128xbf16, #tpu.memory_space<vmem>>, vector<16x16xbf16>
    %152 = arith.truncf %150 : vector<16x64xf32> to vector<16x64xbf16>
    %cst_86 = arith.constant dense<0.000000e+00> : vector<16x64xf32>
    %153 = tpu.matmul %151, %152, %cst_86 {dimension_numbers = #tpu.dot_dimension_numbers<[1], [0], [0], [1], [0, 0, 1, 1], [], []>} : vector<16x16xbf16>, vector<16x64xbf16>, vector<16x64xf32> -> vector<16x64xf32>
    %c80_87 = arith.constant 80 : index
    %c0_88 = arith.constant 0 : index
    %154 = vector.load %arg2[%c80_87, %c0_88] : memref<1864x128xbf16, #tpu.memory_space<vmem>>, vector<16x16xbf16>
    %155 = arith.truncf %150 : vector<16x64xf32> to vector<16x64xbf16>
    %cst_89 = arith.constant dense<0.000000e+00> : vector<16x64xf32>
    %156 = tpu.matmul %154, %155, %cst_89 {dimension_numbers = #tpu.dot_dimension_numbers<[1], [0], [0], [1], [0, 0, 1, 1], [], []>} : vector<16x16xbf16>, vector<16x64xbf16>, vector<16x64xf32> -> vector<16x64xf32>
    %157 = tpu.concatenate %153, %150, %156 in 1 : vector<16x64xf32>, vector<16x64xf32>, vector<16x64xf32> -> vector<16x192xf32>
    %c1304 = arith.constant 1304 : index
    %c0_90 = arith.constant 0 : index
    %158 = vector.load %arg2[%c1304, %c0_90] : memref<1864x128xbf16, #tpu.memory_space<vmem>>, vector<192x32xbf16>
    %159 = arith.truncf %157 : vector<16x192xf32> to vector<16x192xbf16>
    %cst_91 = arith.constant dense<0.000000e+00> : vector<16x32xf32>
    %160 = tpu.matmul %159, %158, %cst_91 {dimension_numbers = #tpu.dot_dimension_numbers<[1], [0], [0], [1], [0, 0, 1, 1], [], []>} : vector<16x192xbf16>, vector<192x32xbf16>, vector<16x32xf32> -> vector<16x32xf32>
    %c1496 = arith.constant 1496 : index
    %c0_92 = arith.constant 0 : index
    %161 = vector.load %arg2[%c1496, %c0_92] : memref<1864x128xbf16, #tpu.memory_space<vmem>>, vector<1x32xbf16>
    %162 = arith.extf %161 : vector<1x32xbf16> to vector<1x32xf32>
    %163 = vector.broadcast %162 : vector<1x32xf32> to vector<16x32xf32>
    %164 = arith.addf %160, %163 : vector<16x32xf32>
    %cst_93 = arith.constant 0.000000e+00 : f32
    %165 = vector.broadcast %cst_93 : f32 to vector<16x32xf32>
    %166 = arith.maximumf %164, %165 : vector<16x32xf32>
    %c1504 = arith.constant 1504 : index
    %c0_94 = arith.constant 0 : index
    %167 = vector.load %arg2[%c1504, %c0_94] : memref<1864x128xbf16, #tpu.memory_space<vmem>>, vector<32x16xbf16>
    %168 = arith.truncf %166 : vector<16x32xf32> to vector<16x32xbf16>
    %cst_95 = arith.constant dense<0.000000e+00> : vector<32x32xf32>
    %169 = tpu.matmul %167, %168, %cst_95 {dimension_numbers = #tpu.dot_dimension_numbers<[1], [0], [0], [1], [0, 0, 1, 1], [], []>} : vector<32x16xbf16>, vector<16x32xbf16>, vector<32x32xf32> -> vector<32x32xf32>
    %c1536 = arith.constant 1536 : index
    %c0_96 = arith.constant 0 : index
    %170 = vector.load %arg2[%c1536, %c0_96] : memref<1864x128xbf16, #tpu.memory_space<vmem>>, vector<32x64xbf16>
    %171 = arith.truncf %169 : vector<32x32xf32> to vector<32x32xbf16>
    %cst_97 = arith.constant dense<0.000000e+00> : vector<32x64xf32>
    %172 = tpu.matmul %171, %170, %cst_97 {dimension_numbers = #tpu.dot_dimension_numbers<[1], [0], [0], [1], [0, 0, 1, 1], [], []>} : vector<32x32xbf16>, vector<32x64xbf16>, vector<32x64xf32> -> vector<32x64xf32>
    %c1568 = arith.constant 1568 : index
    %c0_98 = arith.constant 0 : index
    %173 = vector.load %arg2[%c1568, %c0_98] : memref<1864x128xbf16, #tpu.memory_space<vmem>>, vector<64x16xbf16>
    %174 = arith.truncf %172 : vector<32x64xf32> to vector<32x64xbf16>
    %cst_99 = arith.constant dense<0.000000e+00> : vector<32x16xf32>
    %175 = tpu.matmul %174, %173, %cst_99 {dimension_numbers = #tpu.dot_dimension_numbers<[1], [0], [0], [1], [0, 0, 1, 1], [], []>} : vector<32x64xbf16>, vector<64x16xbf16>, vector<32x16xf32> -> vector<32x16xf32>
    %c1632 = arith.constant 1632 : index
    %c0_100 = arith.constant 0 : index
    %176 = vector.load %arg2[%c1632, %c0_100] : memref<1864x128xbf16, #tpu.memory_space<vmem>>, vector<1x16xbf16>
    %177 = arith.extf %176 : vector<1x16xbf16> to vector<1x16xf32>
    %178 = vector.broadcast %177 : vector<1x16xf32> to vector<32x16xf32>
    %179 = arith.addf %175, %178 : vector<32x16xf32>
    %c0_101 = arith.constant 0 : index
    %c0_102 = arith.constant 0 : index
    %180 = vector.load %arg4[%c0_101, %c0_102] : memref<32x16xf32, #tpu.memory_space<vmem>>, vector<32x16xf32>
    tpu.vector_store %arg4[%c0_101, %c0_102], %179 {strides = array<i32>} : memref<32x16xf32, #tpu.memory_space<vmem>>, vector<32x16xf32>,
    %c1640 = arith.constant 1640 : index
    %c0_103 = arith.constant 0 : index
    %181 = vector.load %arg2[%c1640, %c0_103] : memref<1864x128xbf16, #tpu.memory_space<vmem>>, vector<2x4xbf16>
    %182 = arith.truncf %90 : vector<4x32xf32> to vector<4x32xbf16>
    %cst_104 = arith.constant dense<0.000000e+00> : vector<2x32xf32>
    %183 = tpu.matmul %181, %182, %cst_104 {dimension_numbers = #tpu.dot_dimension_numbers<[1], [0], [0], [1], [0, 0, 1, 1], [], []>} : vector<2x4xbf16>, vector<4x32xbf16>, vector<2x32xf32> -> vector<2x32xf32>
    %c1648 = arith.constant 1648 : index
    %c0_105 = arith.constant 0 : index
    %184 = vector.load %arg2[%c1648, %c0_105] : memref<1864x128xbf16, #tpu.memory_space<vmem>>, vector<32x128xbf16>
    %185 = arith.truncf %183 : vector<2x32xf32> to vector<2x32xbf16>
    %cst_106 = arith.constant dense<0.000000e+00> : vector<2x128xf32>
    %186 = tpu.matmul %185, %184, %cst_106 {dimension_numbers = #tpu.dot_dimension_numbers<[1], [0], [0], [1], [0, 0, 1, 1], [], []>} : vector<2x32xbf16>, vector<32x128xbf16>, vector<2x128xf32> -> vector<2x128xf32>
    %c1680 = arith.constant 1680 : index
    %c0_107 = arith.constant 0 : index
    %187 = vector.load %arg2[%c1680, %c0_107] : memref<1864x128xbf16, #tpu.memory_space<vmem>>, vector<1x128xbf16>
    %188 = arith.extf %187 : vector<1x128xbf16> to vector<1x128xf32>
    %189 = vector.broadcast %188 : vector<1x128xf32> to vector<2x128xf32>
    %190 = arith.addf %186, %189 : vector<2x128xf32>
    %c1688 = arith.constant 1688 : index
    %c0_108 = arith.constant 0 : index
    %191 = vector.load %arg2[%c1688, %c0_108] : memref<1864x128xbf16, #tpu.memory_space<vmem>>, vector<128x32xbf16>
    %192 = arith.truncf %190 : vector<2x128xf32> to vector<2x128xbf16>
    %cst_109 = arith.constant dense<0.000000e+00> : vector<2x32xf32>
    %193 = tpu.matmul %192, %191, %cst_109 {dimension_numbers = #tpu.dot_dimension_numbers<[1], [0], [0], [1], [0, 0, 1, 1], [], []>} : vector<2x128xbf16>, vector<128x32xbf16>, vector<2x32xf32> -> vector<2x32xf32>
    %c1816 = arith.constant 1816 : index
    %c0_110 = arith.constant 0 : index
    %194 = vector.load %arg2[%c1816, %c0_110] : memref<1864x128xbf16, #tpu.memory_space<vmem>>, vector<1x32xbf16>
    %195 = arith.extf %194 : vector<1x32xbf16> to vector<1x32xf32>
    %196 = vector.broadcast %195 : vector<1x32xf32> to vector<2x32xf32>
    %197 = arith.addf %193, %196 : vector<2x32xf32>
    %cst_111 = arith.constant 0.000000e+00 : f32
    %198 = vector.broadcast %cst_111 : f32 to vector<2x32xf32>
    %199 = arith.maximumf %197, %198 : vector<2x32xf32>
    %c1824 = arith.constant 1824 : index
    %c0_112 = arith.constant 0 : index
    %200 = vector.load %arg2[%c1824, %c0_112] : memref<1864x128xbf16, #tpu.memory_space<vmem>>, vector<32x128xbf16>
    %201 = arith.truncf %199 : vector<2x32xf32> to vector<2x32xbf16>
    %cst_113 = arith.constant dense<0.000000e+00> : vector<2x128xf32>
    %202 = tpu.matmul %201, %200, %cst_113 {dimension_numbers = #tpu.dot_dimension_numbers<[1], [0], [0], [1], [0, 0, 1, 1], [], []>} : vector<2x32xbf16>, vector<32x128xbf16>, vector<2x128xf32> -> vector<2x128xf32>
    %c1856 = arith.constant 1856 : index
    %c0_114 = arith.constant 0 : index
    %203 = vector.load %arg2[%c1856, %c0_114] : memref<1864x128xbf16, #tpu.memory_space<vmem>>, vector<1x128xbf16>
    %204 = arith.extf %203 : vector<1x128xbf16> to vector<1x128xf32>
    %205 = vector.broadcast %204 : vector<1x128xf32> to vector<2x128xf32>
    %206 = arith.addf %202, %205 : vector<2x128xf32>
    %c0_115 = arith.constant 0 : index
    %c0_116 = arith.constant 0 : index
    %c0_117 = arith.constant 0 : index
    %207 = vector.load %arg3[%c0_115, %c0_116, %c0_117] : memref<1x2x128xf32, #tpu.memory_space<vmem>>, vector<1x2x128xf32>
    %208 = vector.shape_cast %207 : vector<1x2x128xf32> to vector<2x128xf32>
    %209 = vector.shape_cast %206 : vector<2x128xf32> to vector<1x2x128xf32>
    tpu.vector_store %arg3[%c0_115, %c0_116, %c0_117], %209 {strides = array<i32>} : memref<1x2x128xf32, #tpu.memory_space<vmem>>, vector<1x2x128xf32>,
    return
  }
  func.func @transform_0(%arg0: i32) -> (i32, i32) {
    %c0_i32 = arith.constant 0 : i32
    %c0_i32_0 = arith.constant 0 : i32
    return %arg0, %c0_i32 : i32, i32
  }
  func.func @transform_1(%arg0: i32) -> (i32, i32) {
    %c0_i32 = arith.constant 0 : i32
    %c0_i32_0 = arith.constant 0 : i32
    %c0_i32_1 = arith.constant 0 : i32
    return %c0_i32, %c0_i32_0 : i32, i32
  }
  func.func @transform_2(%arg0: i32) -> (i32, i32, i32) {
    %c0_i32 = arith.constant 0 : i32
    %c0_i32_0 = arith.constant 0 : i32
    %c0_i32_1 = arith.constant 0 : i32
    return %arg0, %c0_i32, %c0_i32_0 : i32, i32, i32
  }
  func.func @transform_3(%arg0: i32) -> (i32, i32) {
    %c0_i32 = arith.constant 0 : i32
    %c0_i32_0 = arith.constant 0 : i32
    return %arg0, %c0_i32 : i32, i32
  }
}

</mosaic_0001>

<bundles_post_ra>
// kernel: forward.1
= control target key start
LH: loop header
LB: loop body
LE: loop exit
PB: predicated region body
PF: predicated region fallthrough
CT: control target
= control target key end

     0   :  { %9 = vsyncpa [#allocation3], 0  ;;  %s2846_s0 = inlined_call_operand.hbm [shape: f32[32,16], index: 0, kind: input, shape index: {}]   ;;  %s2847_s1 = inlined_call_operand.hbm [shape: bf16[1864,128], index: 1, kind: input, shape index: {}]   ;;  %s2848_s2 = inlined_call_operand.hbm [shape: f32[1,2,128], index: 2, kind: output, shape index: {0}]   ;;  %s2849_s3 = inlined_call_operand.hbm [shape: f32[32,16], index: 3, kind: output, shape index: {1}]  }
   0x1   :  { %10 = vsyncpa [#allocation6], 0 }
   0x2   :  { %11 = vsyncpa [#allocation4], 0 }
   0x3   :  { %12 = vsyncpa [#allocation9], 0  ;;  %s17_s14 = sshll.u32 %s2846_s0, 4  ;;  %s2663_s15 = smov [#allocation2]   ;;  %s18_s14 = int_to_ptr.hbm [resolvable:$true] %s17_s14 }
   0x4   :  { %s19_s16 = sshll.u32 %s2663_s15, 4  ;;  %s30_s19 = sshll.u32 %s2847_s1, 4  ;;  %s20_s16 = int_to_ptr.vmem [resolvable:$true] %s19_s16  ;;  %s31_s19 = int_to_ptr.hbm [resolvable:$true] %s30_s19 }
   0x5   :  { %s2664_s20 = smov 128   ;;  %s2665_s21 = smov 8  }
   0x6   :  { %25 = dma.hbm_to_vmem [thread:$0]  %s18_s14, 512, %s20_s16, [#allocation3], %s2664_s20, %s2664_s20, %s2665_s21  }
   0x7   :  { %s2666_s22 = smov [#allocation5]   ;;  %s2667_s24 = smov 64  }
   0x8   :  { %s32_s23 = sshll.u32 %s2666_s22, 4  ;;  %s2668_s0 = smov 4   ;;  %s33_s23 = int_to_ptr.vmem [resolvable:$true] %s32_s23 }
   0x9   :  { %38 = dma.hbm_to_vmem [thread:$0]  %s31_s19, 14912, %s33_s23, [#allocation6], %s2667_s24, %s2667_s24, %s2668_s0  }
   0xa   :  { %2655 = dma.done.wait [#allocation3], 512  }
   0xb   :  { %2656 = vsyncadd [#allocation3], 4294966784 }
   0xc   :  { %2657 = dma.done.wait [#allocation6], 14912  }
   0xd   :  { %2658 = vsyncadd [#allocation6], 4294952384  ;;  %v50_v0 = vld [vmem:[#allocation2 + $0x10] sm:$0xff]  ;;  %v51_v1 = vld [vmem:[#allocation2 + $0x18] sm:$0xff]  ;;  %vm68_vm0 = vcmask 261120   ;;  %s2669_s1 = smov 16  }
   0xe   :  { %v48_v2 = vld [vmem:[#allocation2] sm:$0xff]  ;;  %v57_v3 = vpack.c.bf16 %v51_v1, %v50_v0  ;;  %v49_v4 = vld [vmem:[#allocation2 + $0x8] sm:$0xff]  ;;  %v2410_v6 = vld [vmem:[#allocation5 + $0x10] sm:$0xff]  ;;  %v2534_v11 = vpack.i.bf16 %v51_v1, %v50_v0  ;;  %s2670_s25 = smov 32   ;;  %vm165_vm1 = vcmask 130048   ;;  %vm203_vm2 = vcmask 392192  }
   0xf   :  { %v56_v5 = vpack.c.bf16 %v49_v4, %v48_v2  ;;  %v2408_v7 = vld [vmem:[#allocation5] sm:$0xff]  ;;  %v2411_v8 = vld [vmem:[#allocation5 + $0x18] sm:$0xff]  ;;  %v2409_v9 = vld [vmem:[#allocation5 + $0x8] sm:$0xff]  ;;  %v2524_v10 = vpack.i.bf16 %v49_v4, %v48_v2  ;;  %vm318_vm3 = vcmask 523264   ;;  %vm505_vm4 = vcmask 785408   ;;  %s2671_s26 = smov [#allocation8]  }
  0x10   :  { %120 = vmatpush.bf16.msra.mxu1 %v57_v3  ;;  %81 = vmatpush.bf16.msra.mxu0 %v57_v3  ;;  %v2414_v18 = vld [vmem:[#allocation5 + $0x50] sm:$0xff]  ;;  %v2413_v19 = vld [vmem:[#allocation5 + $0x48] sm:$0xff]  ;;  %v2412_v20 = vld [vmem:[#allocation5 + $0x40] sm:$0xff]  ;;  %vm662_vm5 = vcmask 1043456   ;;  %vm658_vm6 = vcmask 64512   ;;  %vm915_vm7 = vcmask 1041408  }
  0x11   :  { %2525 = vrot.lane.b32.xlu0 %v2524_v10, %s2669_s1  ;;  %2535 = vrot.lane.b32.xlu1 %v2534_v11, %s2669_s1  ;;  %v182_v49 = vld [vmem:[#allocation5 + $0x58] sm:$0x1]  ;;  %v2415_v0 = vld [vmem:[#allocation5 + $0x5c] sm:$0xff]  ;;  %v2416_v1 = vld [vmem:[#allocation5 + $0x64] sm:$0xff]  ;;  %vm911_vm8 = vcmask 31744   ;;  %s1914_s27 = sshll.u32 %s2671_s26, 4  ;;  %s1915_s27 = int_to_ptr.vmem [resolvable:$true] %s1914_s27 }
  0x12   :  { %215 = vmatpush.bf16.msra.mxu2 %v2414_v18  ;;  %v183_v51 = vunpack.c.l.bf16 %v182_v49  ;;  %v2420_v2 = vld [vmem:[#allocation5 + $0x84] sm:$0xff]  ;;  %v2419_v4 = vld [vmem:[#allocation5 + $0x7c] sm:$0xff]  ;;  %s1916_s30 = sshll.u32 %s2849_s3, 4  ;;  %s2672_s4 = smov [#allocation7]   ;;  %s1917_s30 = int_to_ptr.hbm [resolvable:$true] %s1916_s30 }
  0x13   :  { %v2424_v3 = vld [vmem:[#allocation5 + $0xa4] sm:$0xff]  ;;  %s1904_s5 = sshll.u32 %s2672_s4, 4  ;;  %s1906_s8 = sshll.u32 %s2848_s2, 4  ;;  %s1905_s5 = int_to_ptr.vmem [resolvable:$true] %s1904_s5  ;;  %s1907_s8 = int_to_ptr.hbm [resolvable:$true] %s1906_s8 }
  0x14   :  { %121 = vmatpush.bf16.msra.mxu1 %v56_v5  ;;  %82 = vmatpush.bf16.msra.mxu0 %v56_v5  ;;  %v184_v52 = vperm.slane %v183_v51, 0  ;;  %v2423_v5 = vld [vmem:[#allocation5 + $0x9c] sm:$0xff]  ;;  %v2434_v51 = vld [vmem:[#allocation5 + $0xf0] sm:$0xff] }
  0x15   :  { %v2436_v49 = vld [vmem:[#allocation5 + $0x100] sm:$0xff] }
  0x16   :  { %216 = vmatpush.bf16.msra.mxu2 %v2413_v19 }
  0x17   :  { %1953 = vmatmul.msk.bf16.vlgmr.msra.gmra.mxu1 %vm68_vm0, %v2410_v6  ;;  %1943 = vmatmul.msk.bf16.vlgmr.msra.gmra.mxu0 %vm68_vm0, %v2408_v7  ;;  %v2418_v6 = vld [vmem:[#allocation5 + $0x74] sm:$0xff] }
  0x18   :  { %326 = vmatpush.bf16.msrb.mxu0 %v2420_v2  ;;  %372 = vmatpush.bf16.msrb.mxu1 %v2424_v3  ;;  %v2422_v7 = vld [vmem:[#allocation5 + $0x94] sm:$0xff]  ;;  %v2433_v3 = vld [vmem:[#allocation5 + $0xe8] sm:$0xff] }
  0x19   :  { %v2438_v2 = vld [vmem:[#allocation5 + $0x110] sm:$0xff] }
  0x1a   :  { %217 = vmatpush.bf16.msra.mxu2 %v2412_v20 }
  0x1c   :  { %327 = vmatpush.bf16.msrb.mxu0 %v2419_v4  ;;  %373 = vmatpush.bf16.msrb.mxu1 %v2423_v5  ;;  %v2437_v4 = vld [vmem:[#allocation5 + $0x108] sm:$0xff] }
  0x20   :  { %328 = vmatpush.bf16.msrb.mxu0 %v2418_v6  ;;  %374 = vmatpush.bf16.msrb.mxu1 %v2422_v7 }
  0x27   :  { %1954 = vmatmul.msk.bf16.gmra.mxu1 %vm68_vm0, %v2411_v8  ;;  %1944 = vmatmul.msk.bf16.gmra.mxu0 %vm68_vm0, %v2409_v9  ;;  %v2417_v8 = vld [vmem:[#allocation5 + $0x6c] sm:$0xff] }
  0x28   :  { %v2421_v9 = vld [vmem:[#allocation5 + $0x8c] sm:$0xff]  ;;  %329 = vmatpush.bf16.msrb.mxu0 %v2417_v8 }
  0x29   :  { %375 = vmatpush.bf16.msrb.mxu1 %v2421_v9 }
  0x83   :  { %v2526_v22 = vpop.permute.xlu0 %2525  ;;  %v2536_v35 = vpop.permute.xlu1 %2535 }
  0x84   :  { %v2528_v24 = vunpack.i.h.bf16 %v2526_v22  ;;  %v2527_v25 = vunpack.i.l.bf16 %v2526_v22  ;;  %v2538_v36 = vunpack.i.h.bf16 %v2536_v35  ;;  %v2537_v37 = vunpack.i.l.bf16 %v2536_v35  ;;  %v2427_v35 = vld [vmem:[#allocation5 + $0xac] sm:$0xff] }
  0x94   :  { %v123_v12 = vpop.f32.mrf.mxu1  ;;  %v84_v21 = vpop.f32.mrf.mxu0 }
  0x95   :  { %v166_v29 = vsel %vm165_vm1, %v84_v21, %v2527_v25  ;;  %v2724_v25 = vld [vmem:[#allocation5 + $0x20] sm:$0xff] }
  0x9c   :  { %v125_v13 = vpop.f32.mrf.mxu1  ;;  %v86_v23 = vpop.f32.mrf.mxu0 }
  0x9d   :  { %v2529_v14 = vpack.i.bf16 %v125_v13, %v123_v12  ;;  %v167_v30 = vsel %vm165_vm1, %v86_v23, %v2528_v24 }
  0x9f   :  { %2530 = vrot.lane.b32.xlu0 %v2529_v14, %s2670_s25 }
  0xa4   :  { %v128_v15 = vpop.f32.mrf.mxu1  ;;  %v89_v34 = vpop.f32.mrf.mxu0 }
  0xa5   :  { %v168_v42 = vsel %vm165_vm1, %v89_v34, %v2537_v37 }
  0xac   :  { %v130_v16 = vpop.f32.mrf.mxu1  ;;  %v91_v38 = vpop.f32.mrf.mxu0 }
  0xad   :  { %v2539_v17 = vpack.i.bf16 %v130_v16, %v128_v15  ;;  %v169_v43 = vsel %vm165_vm1, %v91_v38, %v2538_v36 }
  0xaf   :  { %2540 = vrot.lane.b32.xlu1 %v2539_v17, %s2670_s25 }
 0x111   :  { %v2531_v26 = vpop.permute.xlu0 %2530 }
 0x112   :  { %v2533_v27 = vunpack.i.h.bf16 %v2531_v26  ;;  %v2532_v28 = vunpack.i.l.bf16 %v2531_v26  ;;  %v2727_v26 = vld [vmem:[#allocation5 + $0x28] sm:$0xff] }
 0x114   :  { %v170_v31 = vsel %vm68_vm0, %v166_v29, %v2532_v28  ;;  %v171_v32 = vsel %vm68_vm0, %v167_v30, %v2533_v27  ;;  %v2432_v27 = vld [vmem:[#allocation5 + $0xd4] sm:$0xff]  ;;  %v2431_v28 = vld [vmem:[#allocation5 + $0xcc] sm:$0xff]  ;;  %v2430_v29 = vld [vmem:[#allocation5 + $0xc4] sm:$0xff] }
 0x115   :  { %v180_v33 = vpack.c.bf16 %v171_v32, %v170_v31  ;;  %511 = vmatpush.bf16.msra.mxu0 %v2432_v27  ;;  %v2429_v30 = vld [vmem:[#allocation5 + $0xbc] sm:$0xff]  ;;  %v2428_v31 = vld [vmem:[#allocation5 + $0xb4] sm:$0xff] }
 0x117   :  { %1967 = vmatmul.msk.bf16.vlgmr.msra.gmra.mxu2 %vm203_vm2, %v180_v33 }
 0x119   :  { %512 = vmatpush.bf16.msra.mxu0 %v2431_v28 }
 0x11d   :  { %513 = vmatpush.bf16.msra.mxu0 %v2430_v29 }
 0x121   :  { %v2541_v39 = vpop.permute.xlu1 %2540  ;;  %514 = vmatpush.bf16.msra.mxu0 %v2429_v30 }
 0x122   :  { %v2543_v40 = vunpack.i.h.bf16 %v2541_v39  ;;  %v2542_v41 = vunpack.i.l.bf16 %v2541_v39 }
 0x124   :  { %v172_v44 = vsel %vm68_vm0, %v168_v42, %v2542_v41  ;;  %v173_v45 = vsel %vm68_vm0, %v169_v43, %v2543_v40 }
 0x125   :  { %v181_v46 = vpack.c.bf16 %v173_v45, %v172_v44  ;;  %515 = vmatpush.bf16.msra.mxu0 %v2428_v31  ;;  %v2441_v31 = vld [vmem:[#allocation5 + $0x128] sm:$0xff] }
 0x127   :  { %1968 = vmatmul.msk.bf16.gmra.mxu2 %vm203_vm2, %v181_v46 }
 0x129   :  { %516 = vmatpush.bf16.msra.mxu0 %v2427_v35 }
 0x19a   :  { %v219_v47 = vpop.f32.mrf.mxu2 }
 0x19b   :  { %v220_v57 = vadd.f32 %v219_v47, %v184_v52 }
 0x19d   :  { %v229_v62 = vmax.f32 %v220_v57, 0.0 }
 0x1a2   :  { %v221_v48 = vpop.f32.mrf.mxu2 }
 0x1a3   :  { %v222_v55 = vadd.f32 %v221_v48, %v184_v52 }
 0x1a5   :  { %v230_v60 = vmax.f32 %v222_v55, 0.0 }
 0x1a7   :  { %v235_v63 = vpack.c.bf16 %v230_v60, %v229_v62 }
 0x1aa   :  { %v224_v50 = vpop.f32.mrf.mxu2 }
 0x1ab   :  { %v225_v53 = vadd.f32 %v224_v50, %v184_v52  ;;  %v2435_v50 = vld [vmem:[#allocation5 + $0xf8] sm:$0xff] }
 0x1ad   :  { %v231_v58 = vmax.f32 %v225_v53, 0.0 }
 0x1b2   :  { %v226_v54 = vpop.f32.mrf.mxu2 }
 0x1b3   :  { %v227_v56 = vadd.f32 %v226_v54, %v184_v52  ;;  %v466_v52 = vld [vmem:[#allocation5 + $0xdc] sm:$0x1] }
 0x1b4   :  { %v467_v53 = vunpack.c.l.bf16 %v466_v52 }
 0x1b5   :  { %v232_v59 = vmax.f32 %v227_v56, 0.0 }
 0x1b6   :  { %v468_v55 = vperm.slane %v467_v53, 0  ;;  %v796_v53 = vld [vmem:[#allocation5 + $0x160] sm:$0x3] }
 0x1b7   :  { %v236_v61 = vpack.c.bf16 %v232_v59, %v231_v58 }
 0x1b9   :  { %251 = vmatpush.bf16.msra.mxu3 %v236_v61 }
 0x1bd   :  { %252 = vmatpush.bf16.msra.mxu3 %v235_v63 }
 0x1c0   :  { %1973 = vmatmul.msk.bf16.vlgmr.msra.gmra.mxu3 %vm68_vm0, %v2415_v0  ;;  %v525_v0 = vld [vmem:[#allocation5 + $0xe0] sm:$0xf] }
 0x1c1   :  { %275 = vmatpush.bf16.msrb.mxu3 %v236_v61  ;;  %v2440_v61 = vld [vmem:[#allocation5 + $0x120] sm:$0xff] }
 0x1c5   :  { %276 = vmatpush.bf16.msrb.mxu3 %v235_v63  ;;  %v543_v63 = vld [vmem:[#allocation5 + $0xe4] sm:$0xf] }
 0x1d0   :  { %1978 = vmatmul.msk.bf16.vlgmr.msrb.gmra.mxu3 %vm68_vm0, %v2416_v1  ;;  %v2439_v1 = vld [vmem:[#allocation5 + $0x118] sm:$0xff] }
 0x243   :  { %v254_v10 = vpop.f32.mrf.mxu3 }
 0x24b   :  { %v256_v11 = vpop.f32.mrf.mxu3 }
 0x253   :  { %v278_v12 = vpop.f32.mrf.mxu3 }
 0x254   :  { %v283_v14 = vmax.f32 %v254_v10, %v278_v12 }
 0x25b   :  { %v280_v13 = vpop.f32.mrf.mxu3 }
 0x25c   :  { %v284_v15 = vmax.f32 %v256_v11, %v280_v13 }
 0x25e   :  { %v293_v16 = vpack.c.bf16 %v284_v15, %v283_v14 }
 0x260   :  { %1995 = vmatmul.msk.bf16.vlgmr.msrb.gmra.mxu0 %vm318_vm3, %v293_v16  ;;  %2012 = vmatmul.msk.bf16.vlgmr.msrb.gmra.mxu1 %vm318_vm3, %v293_v16 }
 0x2dd   :  { %v331_v17 = vpop.f32.mrf.mxu0  ;;  %v377_v18 = vpop.f32.mrf.mxu1 }
 0x2de   :  { %v382_v21 = vmax.f32 %v331_v17, %v377_v18  ;;  %v2753_v17 = vld [vmem:[#allocation5 + $0x30] sm:$0xf]  ;;  %v2755_v18 = vld [vmem:[#allocation5 + $0x34] sm:$0xf] }
 0x2e5   :  { %v333_v19 = vpop.f32.mrf.mxu0  ;;  %v379_v20 = vpop.f32.mrf.mxu1 }
 0x2e6   :  { %v383_v22 = vmax.f32 %v333_v19, %v379_v20  ;;  %v2446_v20 = vld [vmem:[#allocation5 + $0x150] sm:$0xff] }
 0x2e7   :  { %763 = vmatpush.bf16.msrb.mxu0 %v2446_v20 }
 0x2e8   :  { %v386_v23 = vpack.c.bf16 %v383_v22, %v382_v21  ;;  %v2544_v24 = vpack.i.bf16 %v383_v22, %v382_v21  ;;  %v2445_v21 = vld [vmem:[#allocation5 + $0x148] sm:$0xff]  ;;  %v2444_v22 = vld [vmem:[#allocation5 + $0x140] sm:$0xff] }
 0x2ea   :  { %2545 = vrot.lane.b32.xlu2 %v2544_v24, %s2670_s25  ;;  %402 = vmatpush.bf16.msra.mxu3 %v386_v23  ;;  %v2442_v24 = vld [vmem:[#allocation5 + $0x130] sm:$0xff] }
 0x2eb   :  { %426 = vmatpush.bf16.msrb.mxu2 %v386_v23  ;;  %764 = vmatpush.bf16.msrb.mxu0 %v2445_v21  ;;  %v2443_v23 = vld [vmem:[#allocation5 + $0x138] sm:$0xff]  ;;  %v2455_v21 = vld [vmem:[#allocation5 + $0x1a4] sm:$0xff] }
 0x2ed   :  { %2017 = vmatmul.msk.bf16.vlgmr.msra.gmra.mxu3 %vm165_vm1, %v2724_v25 }
 0x2ee   :  { %2022 = vmatmul.msk.bf16.vlgmr.msrb.gmra.mxu2 %vm165_vm1, %v2727_v26 }
 0x2ef   :  { %601 = vmatpush.bf16.msra.mxu2 %v2436_v49  ;;  %765 = vmatpush.bf16.msrb.mxu0 %v2444_v22 }
 0x2f3   :  { %602 = vmatpush.bf16.msra.mxu2 %v2435_v50  ;;  %766 = vmatpush.bf16.msrb.mxu0 %v2443_v23 }
 0x2f7   :  { %603 = vmatpush.bf16.msra.mxu2 %v2434_v51  ;;  %767 = vmatpush.bf16.msrb.mxu0 %v2442_v24 }
 0x2fb   :  { %604 = vmatpush.bf16.msra.mxu2 %v2433_v3  ;;  %768 = vmatpush.bf16.msrb.mxu0 %v2441_v31 }
 0x344   :  { %v2734_v37 = vpop.permute.xlu2 %2545 }
 0x345   :  { %v2548_v39 = vunpack.i.h.bf16 %v2734_v37  ;;  %v2547_v40 = vunpack.i.l.bf16 %v2734_v37  ;;  %v2490_v37 = vld [vmem:[#allocation5 + $0x2cc] sm:$0xff] }
 0x370   :  { %v404_v36 = vpop.f32.mrf.mxu3 }
 0x371   :  { %v428_v32 = vpop.f32.mrf.mxu2  ;;  %v449_v44 = vsel %vm68_vm0, %v404_v36, %v2547_v40 }
 0x378   :  { %v406_v38 = vpop.f32.mrf.mxu3 }
 0x379   :  { %v430_v33 = vpop.f32.mrf.mxu2  ;;  %v450_v45 = vsel %vm68_vm0, %v406_v38, %v2548_v39  ;;  %v2450_v38 = vld [vmem:[#allocation5 + $0x17c] sm:$0xff] }
 0x37a   :  { %v2549_v34 = vpack.i.bf16 %v430_v33, %v428_v32 }
 0x37c   :  { %2550 = vrot.lane.b32.xlu2 %v2549_v34, %s2667_s24 }
 0x3d6   :  { %v2551_v41 = vpop.permute.xlu2 %2550 }
 0x3d7   :  { %v2553_v42 = vunpack.i.h.bf16 %v2551_v41  ;;  %v2552_v43 = vunpack.i.l.bf16 %v2551_v41  ;;  %v2454_v41 = vld [vmem:[#allocation5 + $0x19c] sm:$0xff] }
 0x3d9   :  { %v451_v46 = vsel %vm318_vm3, %v449_v44, %v2552_v43  ;;  %v452_v47 = vsel %vm318_vm3, %v450_v45, %v2553_v42  ;;  %v2449_v42 = vld [vmem:[#allocation5 + $0x174] sm:$0xff]  ;;  %v2448_v43 = vld [vmem:[#allocation5 + $0x16c] sm:$0xff] }
 0x3da   :  { %v465_v48 = vpack.c.bf16 %v452_v47, %v451_v46  ;;  %v719_v44 = vld [vmem:[#allocation5 + $0x158] sm:$0x1] }
 0x3db   :  { %v720_v45 = vunpack.c.l.bf16 %v719_v44  ;;  %v2463_v44 = vld [vmem:[#allocation5 + $0x1e8] sm:$0xff] }
 0x3dc   :  { %2047 = vmatmul.msk.bf16.vlgmr.msra.gmra.mxu0 %vm505_vm4, %v465_v48 }
 0x3dd   :  { %899 = vmatpush.bf16.msra.mxu0 %v2454_v41  ;;  %v721_v46 = vperm.slane %v720_v45, 0  ;;  %v2466_v41 = vld [vmem:[#allocation5 + $0x200] sm:$0xff] }
 0x3de   :  { %v2462_v45 = vld [vmem:[#allocation5 + $0x1e0] sm:$0xff] }
 0x459   :  { %v518_v54 = vpop.f32.mrf.mxu0 }
 0x45a   :  { %v519_v56 = vadd.f32 %v518_v54, %v468_v55  ;;  %v775_v54 = vld [vmem:[#allocation5 + $0x15c] sm:$0x3] }
 0x45c   :  { %v523_v59 = vmax.f32 %v519_v56, 0.0  ;;  %v2452_v56 = vld [vmem:[#allocation5 + $0x18c] sm:$0xff] }
 0x461   :  { %v520_v57 = vpop.f32.mrf.mxu0 }
 0x462   :  { %v521_v58 = vadd.f32 %v520_v57, %v468_v55  ;;  %v2453_v55 = vld [vmem:[#allocation5 + $0x194] sm:$0xff]  ;;  %v2447_v57 = vld [vmem:[#allocation5 + $0x164] sm:$0xff] }
 0x463   :  { %900 = vmatpush.bf16.msra.mxu0 %v2453_v55 }
 0x464   :  { %v524_v60 = vmax.f32 %v521_v58, 0.0  ;;  %v2451_v58 = vld [vmem:[#allocation5 + $0x184] sm:$0xff] }
 0x466   :  { %v526_v62 = vpack.c.bf16 %v524_v60, %v523_v59 }
 0x467   :  { %901 = vmatpush.bf16.msra.mxu0 %v2452_v56  ;;  %v1080_v56 = vld [vmem:[#allocation5 + $0x208] sm:$0x1] }
 0x468   :  { %537 = vmatpush.bf16.msra.mxu1 %v526_v62  ;;  %554 = vmatpush.bf16.msrb.mxu3 %v526_v62 }
 0x46b   :  { %2049 = vmatmul.msk.bf16.vlgmr.msrb.gmra.mxu3 %vm165_vm1, %v543_v63  ;;  %2048 = vmatmul.msk.bf16.vlgmr.msra.gmra.mxu1 %vm165_vm1, %v525_v0 }
 0x46c   :  { %646 = vmatpush.bf16.msrb.mxu1 %v2440_v61  ;;  %902 = vmatpush.bf16.msra.mxu0 %v2451_v58 }
 0x470   :  { %647 = vmatpush.bf16.msrb.mxu1 %v2439_v1 }
 0x474   :  { %648 = vmatpush.bf16.msrb.mxu1 %v2438_v2 }
 0x478   :  { %649 = vmatpush.bf16.msrb.mxu1 %v2437_v4 }
 0x4e8   :  { %v539_v5 = vpop.f32.mrf.mxu1 }
 0x4ee   :  { %v556_v6 = vpop.f32.mrf.mxu3 }
 0x4ef   :  { %v560_v7 = vmax.f32 %v539_v5, %v556_v6 }
 0x4f0   :  { %v541_v8 = vpop.f32.mrf.mxu1 }
 0x4f1   :  { %v569_v9 = vpack.c.bf16 %v560_v7, %v560_v7  ;;  %v909_v7 = vld [vmem:[#allocation5 + $0x38] sm:$0x3]  ;;  %v932_v8 = vld [vmem:[#allocation5 + $0x3c] sm:$0x3] }
 0x4f3   :  { %2066 = vmatmul.msk.bf16.vlgmr.msra.gmra.mxu2 %vm318_vm3, %v569_v9  ;;  %2083 = vmatmul.msk.bf16.vlgmr.msrb.gmra.mxu1 %vm318_vm3, %v569_v9 }
 0x4f6   :  { %v558_v10 = vpop.f32.mrf.mxu3 }
 0x4f7   :  { %v2460_v10 = vld [vmem:[#allocation5 + $0x1cc] sm:$0xff] }
 0x570   :  { %v651_v11 = vpop.f32.mrf.mxu1 }
 0x576   :  { %v606_v12 = vpop.f32.mrf.mxu2 }
 0x577   :  { %v655_v13 = vmax.f32 %v606_v12, %v651_v11  ;;  %v2459_v11 = vld [vmem:[#allocation5 + $0x1c4] sm:$0xff]  ;;  %v2458_v12 = vld [vmem:[#allocation5 + $0x1bc] sm:$0xff] }
 0x578   :  { %v653_v14 = vpop.f32.mrf.mxu1 }
 0x579   :  { %v657_v15 = vpack.c.bf16 %v655_v13, %v655_v13  ;;  %697 = vrot.lane.b32.xlu0 %v655_v13, %s2670_s25  ;;  %v2457_v13 = vld [vmem:[#allocation5 + $0x1b4] sm:$0xff]  ;;  %v2456_v14 = vld [vmem:[#allocation5 + $0x1ac] sm:$0xff] }
 0x57b   :  { %v664_v16 = vsel %vm662_vm5, %v657_v15, 0 }
 0x57c   :  { %673 = vmatpush.bf16.msra.mxu3 %v664_v16  ;;  %690 = vmatpush.bf16.msrb.mxu2 %v664_v16 }
 0x57e   :  { %v608_v19 = vpop.f32.mrf.mxu2 }
 0x57f   :  { %2084 = vmatmul.msk.bf16.vlgmr.msra.gmra.mxu3 %vm658_vm6, %v2753_v17  ;;  %2085 = vmatmul.msk.bf16.vlgmr.msrb.gmra.mxu2 %vm658_vm6, %v2755_v18 }
 0x580   :  { %854 = vmatpush.bf16.msra.mxu2 %v2450_v38 }
 0x584   :  { %855 = vmatpush.bf16.msra.mxu2 %v2449_v42  ;;  %v2465_v42 = vld [vmem:[#allocation5 + $0x1f8] sm:$0xff] }
 0x588   :  { %856 = vmatpush.bf16.msra.mxu2 %v2448_v43  ;;  %v2464_v43 = vld [vmem:[#allocation5 + $0x1f0] sm:$0xff] }
 0x58c   :  { %857 = vmatpush.bf16.msra.mxu2 %v2447_v57  ;;  %v1081_v57 = vunpack.c.l.bf16 %v1080_v56  ;;  %v2484_v56 = vld [vmem:[#allocation5 + $0x29c] sm:$0xff] }
 0x58e   :  { %v1082_v58 = vperm.slane %v1081_v57, 0  ;;  %v2483_v57 = vld [vmem:[#allocation5 + $0x294] sm:$0xff] }
 0x590   :  { %1016 = vmatpush.bf16.msrb.mxu2 %v2460_v10 }
 0x594   :  { %1017 = vmatpush.bf16.msrb.mxu2 %v2459_v11 }
 0x598   :  { %1018 = vmatpush.bf16.msrb.mxu2 %v2458_v12 }
 0x59c   :  { %1019 = vmatpush.bf16.msrb.mxu2 %v2457_v13 }
 0x5a0   :  { %1020 = vmatpush.bf16.msrb.mxu2 %v2456_v14 }
 0x5a4   :  { %1021 = vmatpush.bf16.msrb.mxu2 %v2455_v21  ;;  %v2478_v21 = vld [vmem:[#allocation5 + $0x268] sm:$0xff] }
 0x5eb   :  { %v2762_v32 = vpop.permute.xlu0 %697 }
 0x602   :  { %v675_v27 = vpop.f32.mrf.mxu3  ;;  %v692_v28 = vpop.f32.mrf.mxu2 }
 0x603   :  { %701 = vrot.lane.b32.xlu1 %v692_v28, %s2667_s24  ;;  %v704_v33 = vsel %vm68_vm0, %v675_v27, %v2762_v32 }
 0x60a   :  { %v694_v29 = vpop.f32.mrf.mxu2  ;;  %v677_v30 = vpop.f32.mrf.mxu3 }
 0x60b   :  { %v972_v29 = vld [vmem:[#allocation5 + $0x1d4] sm:$0x1] }
 0x60c   :  { %v973_v30 = vunpack.c.l.bf16 %v972_v29 }
 0x60e   :  { %v974_v31 = vperm.slane %v973_v30, 0 }
 0x675   :  { %v702_v34 = vpop.permute.xlu1 %701 }
 0x676   :  { %v705_v35 = vsel %vm318_vm3, %v704_v33, %v702_v34 }
 0x677   :  { %v718_v36 = vpack.c.bf16 %v705_v35, %v705_v35 }
 0x679   :  { %2110 = vmatmul.msk.bf16.vlgmr.msrb.gmra.mxu0 %vm505_vm4, %v718_v36 }
 0x6f6   :  { %v770_v47 = vpop.f32.mrf.mxu0 }
 0x6f7   :  { %v771_v48 = vadd.f32 %v770_v47, %v721_v46 }
 0x6f9   :  { %v774_v49 = vmax.f32 %v771_v48, 0.0 }
 0x6fb   :  { %v776_v50 = vpack.c.bf16 %v774_v49, %v774_v49 }
 0x6fd   :  { %v781_v51 = vsel %vm662_vm5, %v776_v50, 0  ;;  %v2461_v50 = vld [vmem:[#allocation5 + $0x1d8] sm:$0xff] }
 0x6fe   :  { %v772_v52 = vpop.f32.mrf.mxu0  ;;  %790 = vmatpush.bf16.msra.mxu1 %v781_v51  ;;  %807 = vmatpush.bf16.msrb.mxu3 %v781_v51 }
 0x701   :  { %2112 = vmatmul.msk.bf16.vlgmr.msrb.gmra.mxu3 %vm658_vm6, %v796_v53  ;;  %2111 = vmatmul.msk.bf16.vlgmr.msra.gmra.mxu1 %vm658_vm6, %v775_v54 }
 0x77e   :  { %v792_v59 = vpop.f32.mrf.mxu1 }
 0x784   :  { %v809_v60 = vpop.f32.mrf.mxu3 }
 0x785   :  { %v813_v61 = vmax.f32 %v792_v59, %v809_v60 }
 0x786   :  { %v794_v62 = vpop.f32.mrf.mxu1 }
 0x787   :  { %v822_v63 = vpack.c.bf16 %v813_v61, %v813_v61 }
 0x789   :  { %2129 = vmatmul.msk.bf16.vlgmr.msra.gmra.mxu2 %vm318_vm3, %v822_v63  ;;  %2146 = vmatmul.msk.bf16.vlgmr.msra.gmra.mxu0 %vm318_vm3, %v822_v63 }
 0x78c   :  { %v811_v0 = vpop.f32.mrf.mxu3 }
 0x806   :  { %v904_v1 = vpop.f32.mrf.mxu0 }
 0x80c   :  { %v859_v2 = vpop.f32.mrf.mxu2 }
 0x80d   :  { %v908_v3 = vmax.f32 %v859_v2, %v904_v1  ;;  %v1136_v1 = vld [vmem:[#allocation5 + $0x20c] sm:$0xf]  ;;  %v2467_v2 = vld [vmem:[#allocation5 + $0x210] sm:$0xff] }
 0x80e   :  { %v906_v4 = vpop.f32.mrf.mxu0 }
 0x80f   :  { %v910_v5 = vpack.c.bf16 %v908_v3, %v908_v3  ;;  %950 = vrot.lane.b32.xlu2 %v908_v3, %s2670_s25 }
 0x811   :  { %v2775_v6 = vsel %vm915_vm7, %v910_v5, 0 }
 0x812   :  { %926 = vmatpush.bf16.msrb.mxu1 %v2775_v6  ;;  %943 = vmatpush.bf16.msra.mxu3 %v2775_v6 }
 0x814   :  { %v861_v9 = vpop.f32.mrf.mxu2 }
 0x815   :  { %2147 = vmatmul.msk.bf16.vlgmr.msrb.gmra.mxu1 %vm911_vm8, %v909_v7  ;;  %2148 = vmatmul.msk.bf16.vlgmr.msra.gmra.mxu3 %vm911_vm8, %v932_v8  ;;  %v2473_v9 = vld [vmem:[#allocation5 + $0x240] sm:$0xff] }
 0x816   :  { %1124 = vmatpush.bf16.msrb.mxu3 %v2466_v41  ;;  %v1244_v41 = vld [vmem:[#allocation5 + $0x278] sm:$0x1] }
 0x81a   :  { %1125 = vmatpush.bf16.msrb.mxu3 %v2465_v42  ;;  %v2486_v42 = vld [vmem:[#allocation5 + $0x2ac] sm:$0xff] }
 0x81e   :  { %1126 = vmatpush.bf16.msrb.mxu3 %v2464_v43  ;;  %v1245_v43 = vunpack.c.l.bf16 %v1244_v41  ;;  %v2497_v41 = vld [vmem:[#allocation5 + $0x308] sm:$0xff] }
 0x822   :  { %1127 = vmatpush.bf16.msrb.mxu3 %v2463_v44  ;;  %v2485_v44 = vld [vmem:[#allocation5 + $0x2a4] sm:$0xff] }
 0x826   :  { %1128 = vmatpush.bf16.msrb.mxu3 %v2462_v45  ;;  %v1246_v45 = vperm.slane %v1245_v43, 0  ;;  %v2511_v43 = vld [vmem:[#allocation5 + $0x384] sm:$0xff] }
 0x82a   :  { %1129 = vmatpush.bf16.msrb.mxu3 %v2461_v50 }
 0x869   :  { %v951_v22 = vpop.permute.xlu2 %950 }
 0x892   :  { %v928_v15 = vpop.f32.mrf.mxu1 }
 0x893   :  { %v957_v23 = vsel %vm68_vm0, %v928_v15, %v951_v22  ;;  %v2472_v15 = vld [vmem:[#allocation5 + $0x238] sm:$0xff] }
 0x894   :  { %v2468_v22 = vld [vmem:[#allocation5 + $0x218] sm:$0xff] }
 0x898   :  { %v945_v16 = vpop.f32.mrf.mxu3 }
 0x899   :  { %954 = vrot.lane.b32.xlu0 %v945_v16, %s2667_s24  ;;  %v2479_v16 = vld [vmem:[#allocation5 + $0x270] sm:$0xff] }
 0x89a   :  { %v930_v19 = vpop.f32.mrf.mxu1 }
 0x89b   :  { %v2471_v19 = vld [vmem:[#allocation5 + $0x230] sm:$0xff] }
 0x8a0   :  { %v947_v20 = vpop.f32.mrf.mxu3 }
 0x8a1   :  { %v2469_v20 = vld [vmem:[#allocation5 + $0x220] sm:$0xff] }
 0x90b   :  { %v955_v24 = vpop.permute.xlu0 %954 }
 0x90c   :  { %v958_v27 = vsel %vm318_vm3, %v957_v23, %v955_v24  ;;  %v2477_v23 = vld [vmem:[#allocation5 + $0x260] sm:$0xff] }
 0x90d   :  { %v971_v28 = vpack.c.bf16 %v958_v27, %v958_v27 }
 0x90f   :  { %2173 = vmatmul.msk.bf16.vlgmr.msrb.gmra.mxu2 %vm505_vm4, %v971_v28 }
 0x992   :  { %v1023_v33 = vpop.f32.mrf.mxu2 }
 0x993   :  { %v1024_v34 = vadd.f32 %v1023_v33, %v974_v31 }
 0x995   :  { %v1027_v35 = vpack.c.bf16 %v1024_v34, %v1024_v34  ;;  %1058 = vrot.lane.b32.xlu1 %v1024_v34, %s2670_s25  ;;  %v2481_v34 = vld [vmem:[#allocation5 + $0x284] sm:$0xff] }
 0x997   :  { %v1029_v36 = vsel %vm915_vm7, %v1027_v35, 0  ;;  %v2489_v35 = vld [vmem:[#allocation5 + $0x2c4] sm:$0xff] }
 0x998   :  { %1038 = vmatpush.bf16.msrb.mxu0 %v1029_v36  ;;  %1051 = vmatpush.bf16.msra.mxu1 %v1029_v36  ;;  %v2488_v36 = vld [vmem:[#allocation5 + $0x2bc] sm:$0xff] }
 0x99a   :  { %v1025_v38 = vpop.f32.mrf.mxu2 }
 0x99b   :  { %2174 = vmatmul.msk.bf16.vlgmr.msrb.gmra.mxu0 %vm911_vm8, %v909_v7  ;;  %2175 = vmatmul.msk.bf16.vlgmr.msra.gmra.mxu1 %vm911_vm8, %v932_v8  ;;  %v2475_v7 = vld [vmem:[#allocation5 + $0x250] sm:$0xff]  ;;  %v2474_v8 = vld [vmem:[#allocation5 + $0x248] sm:$0xff] }
 0x99c   :  { %1176 = vmatpush.bf16.msra.mxu0 %v2467_v2  ;;  %v2487_v38 = vld [vmem:[#allocation5 + $0x2b4] sm:$0xff] }
 0x9a0   :  { %1339 = vmatpush.bf16.msrb.mxu0 %v2479_v16 }
 0x9a4   :  { %1340 = vmatpush.bf16.msrb.mxu0 %v2478_v21 }
 0x9a8   :  { %1341 = vmatpush.bf16.msrb.mxu0 %v2477_v23 }
 0xa07   :  { %v1059_v51 = vpop.permute.xlu1 %1058 }
 0xa18   :  { %v1040_v46 = vpop.f32.mrf.mxu0  ;;  %v1053_v47 = vpop.f32.mrf.mxu1 }
 0xa19   :  { %1062 = vrot.lane.b32.xlu2 %v1053_v47, %s2667_s24  ;;  %v1065_v52 = vsel %vm68_vm0, %v1040_v46, %v1059_v51 }
 0xa20   :  { %v1055_v48 = vpop.f32.mrf.mxu1  ;;  %v1042_v49 = vpop.f32.mrf.mxu0 }
 0xa73   :  { %v1063_v53 = vpop.permute.xlu2 %1062 }
 0xa74   :  { %v1066_v54 = vsel %vm318_vm3, %v1065_v52, %v1063_v53 }
 0xa75   :  { %v1079_v55 = vpack.c.bf16 %v1066_v54, %v1066_v54 }
 0xa77   :  { %2200 = vmatmul.msk.bf16.vlgmr.msrb.gmra.mxu3 %vm505_vm4, %v1079_v55  ;;  %v2480_v55 = vld [vmem:[#allocation5 + $0x27c] sm:$0xff] }
 0xafa   :  { %v1131_v59 = vpop.f32.mrf.mxu3 }
 0xafb   :  { %v1132_v60 = vadd.f32 %v1131_v59, %v1082_v58  ;;  %v2482_v58 = vld [vmem:[#allocation5 + $0x28c] sm:$0xff] }
 0xafd   :  { %v1135_v61 = vmax.f32 %v1132_v60, 0.0 }
 0xaff   :  { %v1137_v62 = vpack.c.bf16 %v1135_v61, %v1135_v61 }
 0xb01   :  { %v1142_v63 = vsel %vm915_vm7, %v1137_v62, 0 }
 0xb02   :  { %v1133_v0 = vpop.f32.mrf.mxu3  ;;  %1151 = vmatpush.bf16.msra.mxu2 %v1142_v63 }
 0xb05   :  { %2201 = vmatmul.msk.bf16.vlgmr.msra.gmra.mxu2 %vm911_vm8, %v1136_v1 }
 0xb06   :  { %1322 = vmatpush.bf16.msrb.mxu2 %v2475_v7 }
 0xb0a   :  { %1323 = vmatpush.bf16.msrb.mxu2 %v2474_v8 }
 0xb0e   :  { %1324 = vmatpush.bf16.msrb.mxu2 %v2473_v9 }
 0xb12   :  { %1325 = vmatpush.bf16.msrb.mxu2 %v2472_v15  ;;  %v1470_v15 = vld [vmem:[#allocation5 + $0x2ec] sm:$0x1] }
 0xb13   :  { %v1471_v16 = vunpack.c.l.bf16 %v1470_v15  ;;  %v1671_v15 = vld [vmem:[#allocation5 + $0x330] sm:$0x1] }
 0xb16   :  { %1326 = vmatpush.bf16.msrb.mxu2 %v2471_v19 }
 0xb88   :  { %v1153_v3 = vpop.f32.mrf.mxu2 }
 0xb89   :  { %v1159_v4 = vpack.c.bf16 %v1153_v3, %v1153_v3 }
 0xb8b   :  { %2206 = vmatmul.msk.bf16.vlgmr.msra.gmra.mxu0 %vm165_vm1, %v1159_v4  ;;  %v2492_v4 = vld [vmem:[#allocation5 + $0x2dc] sm:$0xff] }
 0xb90   :  { %v1155_v5 = vpop.f32.mrf.mxu2 }
 0xc08   :  { %v1178_v10 = vpop.f32.mrf.mxu0 }
 0xc09   :  { %v1182_v11 = vsel %vm68_vm0, %v1178_v10, %v2762_v32  ;;  %v2470_v32 = vld [vmem:[#allocation5 + $0x228] sm:$0xff] }
 0xc0a   :  { %1214 = vrot.lane.b32.xlu0 %v1182_v11, %s2667_s24  ;;  %v1183_v12 = vpack.c.bf16 %v1182_v11, %v1182_v11  ;;  %1327 = vmatpush.bf16.msrb.mxu2 %v2470_v32 }
 0xc0c   :  { %v1185_v13 = vsel %vm662_vm5, %v1183_v12, 0 }
 0xc0d   :  { %1194 = vmatpush.bf16.msrb.mxu1 %v1185_v13  ;;  %1207 = vmatpush.bf16.msra.mxu3 %v1185_v13 }
 0xc0e   :  { %1328 = vmatpush.bf16.msrb.mxu2 %v2469_v20  ;;  %v1472_v20 = vperm.slane %v1471_v16, 0  ;;  %v1672_v16 = vunpack.c.l.bf16 %v1671_v15 }
 0xc10   :  { %2207 = vmatmul.msk.bf16.vlgmr.msrb.gmra.mxu1 %vm658_vm6, %v2753_v17  ;;  %2208 = vmatmul.msk.bf16.vlgmr.msra.gmra.mxu3 %vm658_vm6, %v2755_v18  ;;  %v1180_v14 = vpop.f32.mrf.mxu0  ;;  %v2476_v17 = vld [vmem:[#allocation5 + $0x258] sm:$0xff] }
 0xc11   :  { %1342 = vmatpush.bf16.msrb.mxu0 %v2476_v17  ;;  %1396 = vmatpush.bf16.msrb.mxu3 %v2481_v34  ;;  %v1727_v14 = vld [vmem:[#allocation5 + $0x334] sm:$0x1]  ;;  %v2502_v34 = vld [vmem:[#allocation5 + $0x338] sm:$0xff] }
 0xc12   :  { %1329 = vmatpush.bf16.msrb.mxu2 %v2468_v22 }
 0xc15   :  { %1548 = vmatpush.bf16.msra.mxu3 %v2489_v35 }
 0xc19   :  { %1549 = vmatpush.bf16.msra.mxu3 %v2488_v36  ;;  %v2495_v36 = vld [vmem:[#allocation5 + $0x2f8] sm:$0xff] }
 0xc1d   :  { %1550 = vmatpush.bf16.msra.mxu3 %v2487_v38 }
 0xc21   :  { %1551 = vmatpush.bf16.msra.mxu3 %v2486_v42  ;;  %v2496_v42 = vld [vmem:[#allocation5 + $0x300] sm:$0xff] }
 0xc25   :  { %1552 = vmatpush.bf16.msra.mxu3 %v2485_v44  ;;  %v2510_v44 = vld [vmem:[#allocation5 + $0x37c] sm:$0xff] }
 0xc29   :  { %1553 = vmatpush.bf16.msra.mxu3 %v2484_v56 }
 0xc2d   :  { %1554 = vmatpush.bf16.msra.mxu3 %v2483_v57  ;;  %v1749_v57 = vld [vmem:[#allocation5 + $0x348] sm:$0x1] }
 0xc31   :  { %1555 = vmatpush.bf16.msra.mxu3 %v2482_v58 }
 0xc7c   :  { %v1215_v18 = vpop.permute.xlu0 %1214 }
 0xc8d   :  { %v1196_v24 = vpop.f32.mrf.mxu1 }
 0xc8e   :  { %v1217_v27 = vsel %vm318_vm3, %v1196_v24, %v1215_v18 }
 0xc8f   :  { %v1242_v28 = vpack.c.bf16 %v1217_v27, %v1217_v27 }
 0xc91   :  { %1330 = vmatmul.bf16.vlgmr.msrb.gmra.mxu2 %v1242_v28 }
 0xc93   :  { %v1209_v29 = vpop.f32.mrf.mxu3 }
 0xc94   :  { %v1243_v30 = vpack.c.bf16 %v1209_v29, %v1209_v29  ;;  %v2503_v29 = vld [vmem:[#allocation5 + $0x340] sm:$0xff] }
 0xc95   :  { %v1198_v31 = vpop.f32.mrf.mxu1 }
 0xc96   :  { %2257 = vmatmul.msk.bf16.vlgmr.msrb.gmra.mxu0 %vm318_vm3, %v1243_v30  ;;  %v2494_v31 = vld [vmem:[#allocation5 + $0x2f0] sm:$0xff] }
 0xc9b   :  { %v1211_v33 = vpop.f32.mrf.mxu3 }
 0xd13   :  { %v1344_v46 = vpop.f32.mrf.mxu0 }
 0xd14   :  { %v1331_v47 = vpop.f32.mrf.mxu2 }
 0xd15   :  { %v1332_v48 = vadd.f32 %v1331_v47, %v1246_v45  ;;  %v2509_v45 = vld [vmem:[#allocation5 + $0x374] sm:$0xff]  ;;  %v2507_v47 = vld [vmem:[#allocation5 + $0x364] sm:$0xff] }
 0xd17   :  { %v1345_v49 = vadd.f32 %v1344_v46, %v1332_v48  ;;  %v2508_v46 = vld [vmem:[#allocation5 + $0x36c] sm:$0xff]  ;;  %v2506_v48 = vld [vmem:[#allocation5 + $0x35c] sm:$0xff] }
 0xd19   :  { %v1348_v50 = vmax.f32 %v1345_v49, 0.0 }
 0xd1b   :  { %v1351_v51 = vpack.c.bf16 %v1348_v50, %v1348_v50  ;;  %v1346_v52 = vpop.f32.mrf.mxu0  ;;  %v2505_v50 = vld [vmem:[#allocation5 + $0x354] sm:$0xff] }
 0xd1c   :  { %v1333_v53 = vpop.f32.mrf.mxu2 }
 0xd1d   :  { %v1361_v54 = vsel %vm662_vm5, %v1351_v51, 0  ;;  %v2504_v51 = vld [vmem:[#allocation5 + $0x34c] sm:$0xff] }
 0xd1e   :  { %1370 = vmatpush.bf16.msra.mxu1 %v1361_v54  ;;  %v2501_v54 = vld [vmem:[#allocation5 + $0x328] sm:$0xff] }
 0xd21   :  { %2262 = vmatmul.msk.bf16.vlgmr.msra.gmra.mxu1 %vm658_vm6, %v2480_v55 }
 0xd9e   :  { %v1372_v59 = vpop.f32.mrf.mxu1 }
 0xda6   :  { %v1374_v60 = vpop.f32.mrf.mxu1 }
 0xda7   :  { %v1379_v61 = vpack.c.bf16 %v1374_v60, %v1372_v59  ;;  %v1750_v59 = vunpack.c.l.bf16 %v1749_v57 }
 0xda9   :  { %2267 = vmatmul.msk.bf16.vlgmr.msrb.gmra.mxu3 %vm165_vm1, %v1379_v61  ;;  %v1751_v60 = vperm.slane %v1750_v59, 0 }
 0xdaa   :  { %1738 = vmatpush.bf16.msrb.mxu3 %v2775_v6  ;;  %v2493_v6 = vld [vmem:[#allocation5 + $0x2e4] sm:$0xff] }
 0xdab   :  { %1566 = vmatpush.bf16.msra.mxu2 %v2493_v6  ;;  %v2513_v6 = vld [vmem:[#allocation5 + $0x398] sm:$0xff] }
 0xdaf   :  { %1567 = vmatpush.bf16.msra.mxu2 %v2492_v4 }
 0xe2c   :  { %v1398_v62 = vpop.f32.mrf.mxu3 }
 0xe2d   :  { %v1403_v0 = vsel %vm68_vm0, %v1398_v62, %v2547_v40  ;;  %v2491_v40 = vld [vmem:[#allocation5 + $0x2d4] sm:$0xff] }
 0xe2e   :  { %1568 = vmatpush.bf16.msra.mxu2 %v2491_v40  ;;  %v2512_v40 = vld [vmem:[#allocation5 + $0x390] sm:$0xff] }
 0xe32   :  { %1569 = vmatpush.bf16.msra.mxu2 %v2490_v37 }
 0xe34   :  { %v1400_v63 = vpop.f32.mrf.mxu3 }
 0xe35   :  { %v1404_v1 = vsel %vm68_vm0, %v1400_v63, %v2548_v39 }
 0xe36   :  { %v1405_v2 = vpack.c.bf16 %v1404_v1, %v1403_v0  ;;  %v2554_v3 = vpack.i.bf16 %v1404_v1, %v1403_v0  ;;  %1708 = vmatpush.bf16.msrb.mxu2 %v2501_v54  ;;  %v2500_v1 = vld [vmem:[#allocation5 + $0x320] sm:$0xff] }
 0xe38   :  { %2555 = vrot.lane.b32.xlu1 %v2554_v3, %s2667_s24  ;;  %1413 = vmatpush.bf16.msra.mxu0 %v1405_v2  ;;  %v2498_v3 = vld [vmem:[#allocation5 + $0x310] sm:$0xff] }
 0xe39   :  { %1427 = vmatpush.bf16.msrb.mxu1 %v1405_v2  ;;  %v2499_v2 = vld [vmem:[#allocation5 + $0x318] sm:$0xff] }
 0xe3a   :  { %1709 = vmatpush.bf16.msrb.mxu2 %v2500_v1 }
 0xe3b   :  { %2268 = vmatmul.msk.bf16.vlgmr.msra.gmra.mxu0 %vm165_vm1, %v2724_v25 }
 0xe3c   :  { %2269 = vmatmul.msk.bf16.vlgmr.msrb.gmra.mxu1 %vm165_vm1, %v2727_v26 }
 0xe3d   :  { %1648 = vmatpush.bf16.msra.mxu1 %v2497_v41 }
 0xe3e   :  { %1710 = vmatpush.bf16.msrb.mxu2 %v2499_v2 }
 0xe41   :  { %1649 = vmatpush.bf16.msra.mxu1 %v2496_v42 }
 0xe42   :  { %1711 = vmatpush.bf16.msrb.mxu2 %v2498_v3 }
 0xe45   :  { %1848 = vmatpush.bf16.msrb.mxu1 %v2511_v43 }
 0xe49   :  { %1849 = vmatpush.bf16.msrb.mxu1 %v2510_v44 }
 0xe4d   :  { %1850 = vmatpush.bf16.msrb.mxu1 %v2509_v45 }
 0xe51   :  { %1851 = vmatpush.bf16.msrb.mxu1 %v2508_v46 }
 0xe55   :  { %1852 = vmatpush.bf16.msrb.mxu1 %v2507_v47 }
 0xe59   :  { %1853 = vmatpush.bf16.msrb.mxu1 %v2506_v48 }
 0xe5d   :  { %1854 = vmatpush.bf16.msrb.mxu1 %v2505_v50 }
 0xe61   :  { %1855 = vmatpush.bf16.msrb.mxu1 %v2504_v51 }
 0xeaa   :  { %v2556_v7 = vpop.permute.xlu1 %2555 }
 0xeab   :  { %v2558_v8 = vunpack.i.h.bf16 %v2556_v7  ;;  %v2557_v9 = vunpack.i.l.bf16 %v2556_v7  ;;  %v1797_v7 = vld [vmem:[#allocation5 + $0x38c] sm:$0x1] }
 0xeb8   :  { %v1415_v39 = vpop.f32.mrf.mxu0 }
 0xeb9   :  { %v1429_v5 = vpop.f32.mrf.mxu1  ;;  %v1442_v11 = vsel %vm318_vm3, %v1415_v39, %v2557_v9 }
 0xec0   :  { %v1417_v10 = vpop.f32.mrf.mxu0 }
 0xec1   :  { %v1443_v25 = vsel %vm318_vm3, %v1417_v10, %v2558_v8  ;;  %v1431_v12 = vpop.f32.mrf.mxu1  ;;  %v1798_v10 = vunpack.c.l.bf16 %v1797_v7 }
 0xec2   :  { %v1468_v26 = vpack.c.bf16 %v1443_v25, %v1442_v11  ;;  %v1469_v13 = vpack.c.bf16 %v1431_v12, %v1429_v5 }
 0xec3   :  { %v1799_v11 = vperm.slane %v1798_v10, 0 }
 0xec4   :  { %1556 = vmatmul.bf16.vlgmr.msra.gmra.mxu3 %v1468_v26  ;;  %2318 = vmatmul.msk.bf16.vlgmr.msra.gmra.mxu2 %vm318_vm3, %v1469_v13 }
 0xec5   :  { %1891 = vmatpush.bf16.msra.mxu3 %v2513_v6 }
 0xec9   :  { %1892 = vmatpush.bf16.msra.mxu3 %v2512_v40 }
 0xed4   :  { %2357 = vmatmul.msk.bf16.vlgmr.msrb.gmra.mxu3 %vm911_vm8, %v1727_v14 }
 0xf47   :  { %v1557_v19 = vpop.f32.mrf.mxu3  ;;  %v1571_v32 = vpop.f32.mrf.mxu2 }
 0xf48   :  { %v1558_v21 = vadd.f32 %v1557_v19, %v1472_v20  ;;  %v1673_v19 = vperm.slane %v1672_v16, 0 }
 0xf4a   :  { %v1572_v23 = vadd.f32 %v1571_v32, %v1558_v21 }
 0xf4c   :  { %v1576_v27 = vmax.f32 %v1572_v23, 0.0 }
 0xf4f   :  { %v1559_v22 = vpop.f32.mrf.mxu3  ;;  %v1573_v18 = vpop.f32.mrf.mxu2 }
 0xf50   :  { %v1560_v17 = vadd.f32 %v1559_v22, %v1472_v20 }
 0xf52   :  { %v1574_v24 = vadd.f32 %v1573_v18, %v1560_v17  ;;  %v1867_v18 = vld [vmem:[#allocation5 + $0x3a0] sm:$0x1] }
 0xf54   :  { %v1577_v28 = vmax.f32 %v1574_v24, 0.0  ;;  %v1868_v24 = vunpack.c.l.bf16 %v1867_v18 }
 0xf56   :  { %v1582_v30 = vpack.c.bf16 %v1577_v28, %v1576_v27 }
 0xf57   :  { %v1740_v33 = vpop.f32.mrf.mxu3 }
 0xf58   :  { %1606 = vmatpush.bf16.msrb.mxu0 %v1582_v30  ;;  %v1748_v38 = vpack.c.bf16 %v1740_v33, %v1740_v33 }
 0xf5b   :  { %2327 = vmatmul.msk.bf16.vlgmr.msrb.gmra.mxu0 %vm165_vm1, %v2494_v31 }
 0xf5c   :  { %1773 = vmatpush.bf16.msra.mxu0 %v2503_v29  ;;  %v1869_v29 = vperm.slane %v1868_v24, 0 }
 0xf5f   :  { %v1742_v35 = vpop.f32.mrf.mxu3 }
 0xf60   :  { %1774 = vmatpush.bf16.msra.mxu0 %v2502_v34 }
 0xf6b   :  { %2328 = vmatmul.msk.bf16.gmra.mxu0 %vm165_vm1, %v2495_v36 }
 0xf7b   :  { %2366 = vmatmul.msk.bf16.vlgmr.msra.gmra.mxu0 %vm68_vm0, %v1748_v38 }
 0xfd8   :  { %v1608_v49 = vpop.f32.mrf.mxu0 }
 0xfe0   :  { %v1610_v52 = vpop.f32.mrf.mxu0 }
 0xfe1   :  { %v1622_v53 = vpack.c.bf16 %v1610_v52, %v1608_v49 }
 0xfe3   :  { %2337 = vmatmul.msk.bf16.vlgmr.msra.gmra.mxu1 %vm68_vm0, %v1622_v53 }
 0xfe8   :  { %v1613_v55 = vpop.f32.mrf.mxu0 }
 0xff0   :  { %v1615_v56 = vpop.f32.mrf.mxu0 }
 0xff1   :  { %v1623_v58 = vpack.c.bf16 %v1615_v56, %v1613_v55 }
 0xff3   :  { %2338 = vmatmul.msk.bf16.gmra.mxu1 %vm68_vm0, %v1623_v58 }
 0xff8   :  { %v1776_v61 = vpop.f32.mrf.mxu0 }
 0xff9   :  { %v1777_v62 = vadd.f32 %v1776_v61, %v1751_v60 }
 0xffb   :  { %v1796_v63 = vpack.c.bf16 %v1777_v62, %v1777_v62 }
0x1000   :  { %v1778_v0 = vpop.f32.mrf.mxu0 }
0x1003   :  { %1856 = vmatmul.bf16.vlgmr.msrb.gmra.mxu1 %v1796_v63 }
0x1060   :  { %v1651_v4 = vpop.f32.mrf.mxu1 }
0x1068   :  { %v1653_v37 = vpop.f32.mrf.mxu1 }
0x1069   :  { %v1669_v39 = vpack.c.bf16 %v1653_v37, %v1651_v4 }
0x106b   :  { %2355 = vmatmul.msk.bf16.vlgmr.msrb.gmra.mxu2 %vm318_vm3, %v1669_v39 }
0x1070   :  { %v1656_v5 = vpop.f32.mrf.mxu1 }
0x1078   :  { %v1658_v8 = vpop.f32.mrf.mxu1 }
0x1079   :  { %v1670_v9 = vpack.c.bf16 %v1658_v8, %v1656_v5 }
0x107b   :  { %2356 = vmatmul.msk.bf16.gmra.mxu2 %vm318_vm3, %v1670_v9 }
0x1080   :  { %v1857_v25 = vpop.f32.mrf.mxu1 }
0x1081   :  { %v1858_v12 = vadd.f32 %v1857_v25, %v1799_v11 }
0x1083   :  { %v1861_v26 = vmax.f32 %v1858_v12, 0.0 }
0x1085   :  { %v1866_v13 = vpack.c.bf16 %v1861_v26, %v1861_v26 }
0x1087   :  { %2407 = vmatmul.msk.bf16.vlgmr.msra.gmra.mxu3 %vm68_vm0, %v1866_v13 }
0x1088   :  { %v1859_v14 = vpop.f32.mrf.mxu1 }
0x10ee   :  { %v1713_v32 = vpop.f32.mrf.mxu2 }
0x10ef   :  { %v1714_v20 = vadd.f32 %v1713_v32, %v1673_v19 }
0x10f1   :  { %1723 = vst.msk [vmem:[#allocation8] sm:$0xff] %vm165_vm1, %v1714_v20 }
0x10f6   :  { %v1715_v21 = vpop.f32.mrf.mxu2 }
0x10f7   :  { %v1716_v22 = vadd.f32 %v1715_v21, %v1673_v19 }
0x10f9   :  { %1724 = vst.msk [vmem:[#allocation8 + $0x8] sm:$0xff] %vm165_vm1, %v1716_v22 }
0x10fe   :  { %v1718_v23 = vpop.f32.mrf.mxu2 }
0x10ff   :  { %v1719_v17 = vadd.f32 %v1718_v23, %v1673_v19 }
0x1101   :  { %1725 = vst.msk [vmem:[#allocation8 + $0x10] sm:$0xff] %vm165_vm1, %v1719_v17 }
0x1106   :  { %v1720_v27 = vpop.f32.mrf.mxu2 }
0x1107   :  { %v1721_v28 = vadd.f32 %v1720_v27, %v1673_v19 }
0x1109   :  { %1726 = vst.msk [vmem:[#allocation8 + $0x18] sm:$0xff] %vm165_vm1, %v1721_v28 }
0x110a   :  { %v1894_v30 = vpop.f32.mrf.mxu3  ;;  %1922 = dma.vmem_to_hbm [thread:$0]  %s1915_s27, 512, %s1917_s30, [#allocation9], %s2664_s20, %s2664_s20, %s2665_s21  }
0x110b   :  { %v1895_v31 = vadd.f32 %v1894_v30, %v1869_v29 }
0x110d   :  { %1898 = vst [vmem:[#allocation7] sm:$0x3] %v1895_v31 }
0x110e   :  { %1909 = dma.vmem_to_hbm [thread:$0]  %s1905_s5, 32, %s1907_s8, [#allocation4]  }
0x1112   :  { %v1896_v33 = vpop.f32.mrf.mxu3 }
0x1113   :  { %2659 = dma.done.wait [#allocation4], 32  }
0x1114   :  { %2660 = vsyncadd [#allocation4], 4294967264 }
0x1115   :  { %2661 = dma.done.wait [#allocation9], 512  }
0x1116   :  { %2662 = vsyncadd [#allocation9], 4294966784 }
0x1117   :  { %1931 = vsyncpa [#allocation3], 1 }
0x1118   :  { %1932 = vsyncpa [#allocation6], 1 }
0x1119   :  { %1933 = vsyncpa [#allocation4], 1 }
0x111a   :  { %1934 = vsyncpa [#allocation9], 1 }

</bundles_post_ra>
